<compile_context>
chip_gen: v7x
topology: tpu7x:2x2x1
jax: 0.10.0
libtpu: 0.0.40
codegen_flags: <defaults>
</compile_context>

<pallas_src>
import math
import functools

import jax
import jax.numpy as jnp
from jax import lax
from jax.experimental import pallas as pl
from jax.experimental.pallas import tpu as pltpu


VMEM = functools.partial(pl.BlockSpec, memory_space=pltpu.MemorySpace.VMEM)
SMEM = functools.partial(pl.BlockSpec, memory_space=pltpu.MemorySpace.SMEM)


# ---------------------------------------------------------------------------
# The single fused kernel.
#   xw_ref   : (C, R*E)        f32   x in column-frame layout
#   wqkv_ref : (R*E, 3*H*R*D)  f32   block-diag expanded [q|k|v] weights
#   bqkv_ref : (1, 3*H*R*D)    f32
#   mod_ref  : (H+2, 1, H*R*D) f32   rows 0..H-1: head masks,
#                                    row H: tiled wqa, row H+1: tiled wqb
#   net_ref  : (M, C, C)       f32
#   l_ref    : (H, 1)          f32
#   wo_ref   : (H*R*D, R*E)    f32   block-diag expanded out-proj weight
#   bo_ref   : (1, R*E)        f32
#   cab_ref  : (2,)            f32   SMEM scalars (folded q1/k1 bias terms)
# outputs:
#   out_ref  : (C, R*E)        f32   lane-dense output slab
#   probs_ref: (H, C, C)       f32
# ---------------------------------------------------------------------------
def _row_attention_kernel(H, C, xw_ref, wqkv_ref, bqkv_ref, mod_ref, net_ref,
                          l_ref, wo_ref, bo_ref, cab_ref, out_ref, probs_ref):
    f32 = jnp.float32
    HRD = mod_ref.shape[-1]                                   # H * R * D

    # (1) fused q/k/v projection, directly in the (C, H*R*D) full-contraction
    #     layout (layout permutation is baked into wqkv).
    qkv = jnp.dot(xw_ref[...], wqkv_ref[...],
                  preferred_element_type=f32) + bqkv_ref[...]     # (C, 3*HRD)
    q_full = qkv[:, :HRD]                 # lane-tile aligned slices (256-wide)
    k_full = qkv[:, HRD:2 * HRD]
    v_full = qkv[:, 2 * HRD:]

    # (2) ALL attention logits in ONE NT MXU pass over the full 256-wide
    #     contraction:
    #       rows [0, H*C)        -> per-head q.k logits   s[h, i, j]
    #       rows [H*C, H*C+C)    -> network-attention a_raw
    #       rows [H*C+C, H*C+2C) -> network-attention b_raw
    mod = mod_ref[...]                                            # (H+2,1,HRD)
    q_stack = (q_full[None, :, :] * mod).reshape((H + 2) * C, HRD)
    nt = (((1,), (1,)), ((), ()))                     # contract last dims (NT)
    s_all = lax.dot_general(q_stack, k_full, nt,
                            preferred_element_type=f32)           # ((H+2)*C, C)

    s = s_all[:H * C, :].reshape(H, C, C)
    a_coef = s_all[H * C:(H + 1) * C, :] * f32(1.0 / H) + cab_ref[0]
    b_coef = s_all[(H + 1) * C:, :] * f32(1.0 / H) + cab_ref[1]

    # (3) network-attention softmax over depth M (leading axis), modulate &
    #     reduce.  All f32 on the VPU/EUP, exact normalization.
    net = net_ref[...]                                            # (M, C, C)
    na = net * a_coef[None, :, :] + b_coef[None, :, :]
    na = jnp.exp(na - jnp.max(na, axis=0, keepdims=True))
    na = na / jnp.sum(na, axis=0, keepdims=True)
    netw = jnp.sum(net * na, axis=0)                              # (C, C)

    # (4) per-head gate, diagonal mask, softmax over keys (all heads batched).
    lv = l_ref[...]                                               # (H, 1)
    logits = s + lv[:, :, None] * netw[None, :, :]                # (H, C, C)
    row = lax.broadcasted_iota(jnp.int32, (C, C), 0)
    col = lax.broadcasted_iota(jnp.int32, (C, C), 1)
    logits = jnp.where((row == col)[None, :, :], f32(-1000000000.0), logits)
    logits = logits - jnp.max(logits, axis=-1, keepdims=True)
    p = jnp.exp(logits)
    p = p / jnp.sum(p, axis=-1, keepdims=True)        # exact (review request)
    # probs stay (H, C, C): lane-densifying this 4 KiB store would need a
    # sublane->lane relayout that costs more than the masked store it removes.
    probs_ref[...] = p

    # (5) context in the same (C, H*R*D) frame via head-masked v (no lane
    #     slicing at non-128 offsets), then the out-projection folds in via
    #     the block-diag Wo expansion -> lane-dense (C, R*E) output slab.
    v_stack = v_full[None, :, :] * mod[:H]                        # (H, C, HRD)
    ctx = jnp.dot(p[0], v_stack[0], preferred_element_type=f32)
    for h in range(1, H):                 # static, H tiny MXU pushes
        ctx = ctx + jnp.dot(p[h], v_stack[h], preferred_element_type=f32)
    out_ref[...] = (jnp.dot(ctx, wo_ref[...], preferred_element_type=f32)
                    + bo_ref[...]).astype(out_ref.dtype)


# ---------------------------------------------------------------------------
# Wrapper reproducing Row_Attention.forward(x, network, return_attn=False)
# ---------------------------------------------------------------------------
def row_attention_forward(x, network, params):
    R, C, N, E = x.shape
    H = params["num_heads"]
    D = E // H
    assert N == 1, "head-repeated network broadcast requires batch_size == 1"
    RD, HRD = R * D, H * R * D
    scaling = (D ** -0.5) / math.sqrt(R)        # align_scaling
    f32 = jnp.float32

    # ---- constant weight prep --------------------------------------------
    # NOTE(perf): params are closure constants -> this whole block constant-
    # folds at trace time.  If params ever become traced arguments (training,
    # donated buffers), hoist it out and precompute once per step.
    eyeR = jnp.eye(R, dtype=f32)

    def expand_qkv(W, scale):
        # (R*E, HRD): big[r*E+e, h*RD + r2*D + d] = delta(r, r2) * scale*W[h*D+d, e]
        Wt = (W * scale).reshape(H, D, E).astype(f32)            # [h, d, e]
        return jnp.einsum('pq,hde->pehqd', eyeR, Wt).reshape(R * E, HRD)

    def expand_bias(b, scale):
        # (HRD,): bias[h*RD + r*D + d] = scale * b[h*D + d]
        return jnp.broadcast_to((b * scale).reshape(H, 1, D),
                                (H, R, D)).reshape(HRD).astype(f32)

    w_qkv = jnp.concatenate([expand_qkv(params["Wq"], scaling),
                             expand_qkv(params["Wk"], 1.0),
                             expand_qkv(params["Wv"], 1.0)], axis=1)   # (R*E, 3*HRD)
    b_qkv = jnp.concatenate([expand_bias(params["bq"], scaling),
                             expand_bias(params["bk"], 1.0),
                             expand_bias(params["bv"], 1.0)]).reshape(1, 3 * HRD)

    # Head-selection masks + folded q1/k1 contraction vectors, kept f32 so the
    # in-kernel pre-MXU elementwise multiplies are f32 (no bf16 VPU, v5e note).
    head_mask = jnp.repeat(jnp.eye(H, dtype=f32), RD, axis=1)          # (H, HRD)
    wqa = params["k1_W"][:, 0] @ params["q1_W"]                        # (D,)
    wqb = params["k1_b"] @ params["q1_W"]                              # (D,)
    mod = jnp.concatenate([head_mask,
                           jnp.tile(wqa, H * R).reshape(1, HRD),
                           jnp.tile(wqb, H * R).reshape(1, HRD)],
                          axis=0).astype(f32).reshape(H + 2, 1, HRD)
    c_ab = jnp.stack([params["k1_W"][:, 0] @ params["q1_b"],
                      params["k1_b"] @ params["q1_b"]]).astype(f32)    # (2,)

    # Out-projection expanded block-diagonally over rows so the (C, HRD)
    # context maps straight onto the (C, R*E) output slab.
    Wo_r = params["Wo"].reshape(E, H, D).astype(f32)                   # [e, h, d]
    w_o = jnp.einsum('pq,ehd->hpdqe', eyeR, Wo_r).reshape(HRD, R * E)
    b_o = jnp.tile(params["bo"].astype(f32), R).reshape(1, R * E)
    lvec = params["l"].reshape(H, 1).astype(f32)

    # ---- input layout plumbing (two tiny XLA transposes total) -------------
    xw = jnp.transpose(x[:, :, 0, :], (1, 0, 2)).reshape(C, R * E).astype(f32)
    net_mcc = jnp.transpose(network.reshape(N, C, C, -1)[0],
                            (2, 0, 1)).astype(f32)                     # (M, C, C)

    # ---- the single fused pallas_call --------------------------------------
    out_wide, probs3 = pl.pallas_call(
        functools.partial(_row_attention_kernel, H, C),
        out_shape=(jax.ShapeDtypeStruct((C, R * E), f32),
                   jax.ShapeDtypeStruct((H, C, C), f32)),
        in_specs=[VMEM()] * 8 + [SMEM()],
        out_specs=(VMEM(), VMEM()),
    )(xw, w_qkv, b_qkv, mod, net_mcc, lvec, w_o, b_o, c_ab)

    output = jnp.transpose(out_wide.reshape(C, R, E), (1, 0, 2)).reshape(R, C, N, E)
    probs = probs3.reshape(H, N, C, C)
    return output, probs, params["l"]
    # TODO(synk): the pred() branch (return_attn=True, chunked-row path) is a
    # separate code path and is not implemented here.


# ---------------------------------------------------------------------------
# Pure-JAX f32 reference (mirrors the torch code literally) for verification.
# ---------------------------------------------------------------------------
def reference_forward(x, network, params):
    R, C, N, E = x.shape
    H = params["num_heads"]
    D = E // H
    scaling = (D ** -0.5) / math.sqrt(R)

    def lin(a, W, b):
        return a @ W.T + b

    q = (lin(x, params["Wq"], params["bq"]) * scaling).reshape(R, C, N, H, D)
    k = lin(x, params["Wk"], params["bk"]).reshape(R, C, N, H, D)
    v = lin(x, params["Wv"], params["bv"]).reshape(R, C, N, H, D)
    net = network.reshape(N, C, C, -1)

    T = jnp.einsum("rinhd,rjnhd->hnijd", q, k)
    Q8 = jnp.einsum("hnijd,ed->hnije", T, params["q1_W"]) + params["q1_b"]
    Q8 = Q8.mean(0)                                            # (N,C,C,8)
    net_k = net[..., None] * params["k1_W"][:, 0] + params["k1_b"]
    na = jnp.einsum("nije,nijme->nijm", Q8, net_k)
    na = jnp.tile(na, (H, 1, 1, 1))                            # repeat over heads
    na = jax.nn.softmax(na, axis=-1)
    netw = (net * na).sum(-1)[:, None]                         # (H,1,C,C) for N=1

    aw = jnp.einsum("rinhd,rjnhd->hnij", q, k)
    aw = aw + params["l"] * netw
    eye = jnp.eye(C, dtype=bool)
    aw = jnp.where(eye[None, None], -1000000000.0, aw)
    probs = jax.nn.softmax(aw, axis=-1)

    ctx = jnp.einsum("hnij,rjnhd->rinhd", probs, v).reshape(R, C, N, E)
    out = lin(ctx, params["Wo"], params["bo"])
    return out, probs, params["l"]


# ---------------------------------------------------------------------------
# Deterministic parameter init (shapes from Row_Attention.__init__)
# ---------------------------------------------------------------------------
def init_params(key, embed_dim, num_heads):
    D = embed_dim // num_heads
    keys = jax.random.split(key, 7)

    def lin_init(k, out_f, in_f):
        kw, kb = jax.random.split(k)
        bound = 1.0 / math.sqrt(in_f)
        W = jax.random.uniform(kw, (out_f, in_f), jnp.float32, -bound, bound)
        b = jax.random.uniform(kb, (out_f,), jnp.float32, -bound, bound)
        return W, b

    Wq, bq = lin_init(keys[0], embed_dim, embed_dim)
    Wk, bk = lin_init(keys[1], embed_dim, embed_dim)
    Wv, bv = lin_init(keys[2], embed_dim, embed_dim)
    Wo, bo = lin_init(keys[3], embed_dim, embed_dim)
    q1_W, q1_b = lin_init(keys[4], 8, D)     # q1_proj: Linear(head_dim, 8)
    k1_W, k1_b = lin_init(keys[5], 8, 1)     # k1_proj: Linear(1, 8)
    l = jax.random.normal(keys[6], (num_heads, 1, 1, 1), jnp.float32)
    return dict(num_heads=num_heads,
                Wq=Wq, bq=bq, Wk=Wk, bk=bk, Wv=Wv, bv=bv, Wo=Wo, bo=bo,
                q1_W=q1_W, q1_b=q1_b, k1_W=k1_W, k1_b=k1_b, l=l)


if __name__ == "__main__":
    R, C, N, E, H, M = 4, 16, 1, 64, 4, 4   # rows, cols, batch, embed, heads, net depth

    key = jax.random.PRNGKey(0)
    k_param, k_x, k_net = jax.random.split(key, 3)
    params = init_params(k_param, E, H)
    x = jax.random.normal(k_x, (R, C, N, E), jnp.float32)
    network = jax.random.normal(k_net, (N, C, C, M), jnp.float32)

    fwd = jax.jit(lambda xx, nn: row_attention_forward(xx, nn, params))
    out, probs, l = fwd(x, network)
    jax.block_until_ready((out, probs))

    out_ref, probs_ref, _ = reference_forward(x, network, params)
    assert jnp.allclose(probs, probs_ref, atol=2e-2, rtol=2e-2), "attn_probs mismatch"
    assert jnp.allclose(out, out_ref, atol=3e-2, rtol=3e-2), "output mismatch"

    print("KERNEL_OK")
</pallas_src>

<mosaic_0001>
module attributes {stable_mosaic.version = 11 : i64} {
  func.func @_row_attention_kernel(%arg0: memref<16x256xf32, #tpu.memory_space<vmem>>, %arg1: memref<256x768xf32, #tpu.memory_space<vmem>>, %arg2: memref<1x768xf32, #tpu.memory_space<vmem>>, %arg3: memref<6x1x256xf32, #tpu.memory_space<vmem>>, %arg4: memref<4x16x16xf32, #tpu.memory_space<vmem>>, %arg5: memref<4x1xf32, #tpu.memory_space<vmem>>, %arg6: memref<256x256xf32, #tpu.memory_space<vmem>>, %arg7: memref<1x256xf32, #tpu.memory_space<vmem>>, %arg8: memref<2xf32, #tpu.memory_space<smem>>, %arg9: memref<16x256xf32, #tpu.memory_space<vmem>>, %arg10: memref<4x16x16xf32, #tpu.memory_space<vmem>>) attributes {dimension_semantics = [], scalar_prefetch = 0 : i64, scratch_operands = 0 : i64, tpu.core_type = #tpu.core_type<tc>} {
    %c0 = arith.constant 0 : index
    %c0_0 = arith.constant 0 : index
    %0 = vector.load %arg0[%c0, %c0_0] : memref<16x256xf32, #tpu.memory_space<vmem>>, vector<16x256xf32>
    %c0_1 = arith.constant 0 : index
    %c0_2 = arith.constant 0 : index
    %1 = vector.load %arg1[%c0_1, %c0_2] : memref<256x768xf32, #tpu.memory_space<vmem>>, vector<256x768xf32>
    %cst = arith.constant dense<0.000000e+00> : vector<16x768xf32>
    %2 = tpu.matmul %0, %1, %cst {dimension_numbers = #tpu.dot_dimension_numbers<[1], [0], [0], [1], [0, 0, 1, 1], [], []>} : vector<16x256xf32>, vector<256x768xf32>, vector<16x768xf32> -> vector<16x768xf32>
    %c0_3 = arith.constant 0 : index
    %c0_4 = arith.constant 0 : index
    %3 = vector.load %arg2[%c0_3, %c0_4] : memref<1x768xf32, #tpu.memory_space<vmem>>, vector<1x768xf32>
    %4 = vector.broadcast %3 : vector<1x768xf32> to vector<16x768xf32>
    %5 = arith.addf %2, %4 : vector<16x768xf32>
    %6 = vector.extract_strided_slice %5 {offsets = [0, 0], sizes = [16, 256], strides = [1, 1]} : vector<16x768xf32> to vector<16x256xf32>
    %7 = vector.extract_strided_slice %5 {offsets = [0, 256], sizes = [16, 256], strides = [1, 1]} : vector<16x768xf32> to vector<16x256xf32>
    %8 = vector.extract_strided_slice %5 {offsets = [0, 512], sizes = [16, 256], strides = [1, 1]} : vector<16x768xf32> to vector<16x256xf32>
    %c0_5 = arith.constant 0 : index
    %c0_6 = arith.constant 0 : index
    %c0_7 = arith.constant 0 : index
    %9 = vector.load %arg3[%c0_5, %c0_6, %c0_7] : memref<6x1x256xf32, #tpu.memory_space<vmem>>, vector<6x1x256xf32>
    %10 = vector.shape_cast %6 : vector<16x256xf32> to vector<1x16x256xf32>
    %11 = vector.broadcast %10 : vector<1x16x256xf32> to vector<6x16x256xf32>
    %12 = vector.broadcast %9 : vector<6x1x256xf32> to vector<6x16x256xf32>
    %13 = arith.mulf %11, %12 : vector<6x16x256xf32>
    %14 = vector.shape_cast %13 : vector<6x16x256xf32> to vector<96x256xf32>
    %cst_8 = arith.constant dense<0.000000e+00> : vector<96x16xf32>
    %15 = tpu.matmul %14, %7, %cst_8 {dimension_numbers = #tpu.dot_dimension_numbers<[1], [1], [0], [0], [0, 0, 1, 0], [], []>} : vector<96x256xf32>, vector<16x256xf32>, vector<96x16xf32> -> vector<96x16xf32>
    %16 = vector.extract_strided_slice %15 {offsets = [0, 0], sizes = [64, 16], strides = [1, 1]} : vector<96x16xf32> to vector<64x16xf32>
    %17 = vector.shape_cast %16 : vector<64x16xf32> to vector<4x16x16xf32>
    %18 = vector.extract_strided_slice %15 {offsets = [64, 0], sizes = [16, 16], strides = [1, 1]} : vector<96x16xf32> to vector<16x16xf32>
    %cst_9 = arith.constant 2.500000e-01 : f32
    %19 = vector.broadcast %cst_9 : f32 to vector<16x16xf32>
    %20 = arith.mulf %18, %19 : vector<16x16xf32>
    %c0_10 = arith.constant 0 : index
    %21 = memref.load %arg8[%c0_10] : memref<2xf32, #tpu.memory_space<smem>>
    %22 = vector.broadcast %21 : f32 to vector<16x16xf32>
    %23 = arith.addf %20, %22 : vector<16x16xf32>
    %24 = vector.extract_strided_slice %15 {offsets = [80, 0], sizes = [16, 16], strides = [1, 1]} : vector<96x16xf32> to vector<16x16xf32>
    %cst_11 = arith.constant 2.500000e-01 : f32
    %25 = vector.broadcast %cst_11 : f32 to vector<16x16xf32>
    %26 = arith.mulf %24, %25 : vector<16x16xf32>
    %c1 = arith.constant 1 : index
    %27 = memref.load %arg8[%c1] : memref<2xf32, #tpu.memory_space<smem>>
    %28 = vector.broadcast %27 : f32 to vector<16x16xf32>
    %29 = arith.addf %26, %28 : vector<16x16xf32>
    %c0_12 = arith.constant 0 : index
    %c0_13 = arith.constant 0 : index
    %c0_14 = arith.constant 0 : index
    %30 = vector.load %arg4[%c0_12, %c0_13, %c0_14] : memref<4x16x16xf32, #tpu.memory_space<vmem>>, vector<4x16x16xf32>
    %31 = vector.shape_cast %23 : vector<16x16xf32> to vector<1x16x16xf32>
    %32 = vector.broadcast %31 : vector<1x16x16xf32> to vector<4x16x16xf32>
    %33 = arith.mulf %30, %32 : vector<4x16x16xf32>
    %34 = vector.shape_cast %29 : vector<16x16xf32> to vector<1x16x16xf32>
    %35 = vector.broadcast %34 : vector<1x16x16xf32> to vector<4x16x16xf32>
    %36 = arith.addf %33, %35 : vector<4x16x16xf32>
    %cst_15 = arith.constant dense<0xFF800000> : vector<16x16xf32>
    %37 = vector.multi_reduction <maximumf>, %36, %cst_15 [0] : vector<4x16x16xf32> to vector<16x16xf32>
    %38 = vector.shape_cast %37 : vector<16x16xf32> to vector<1x16x16xf32>
    %39 = vector.broadcast %38 : vector<1x16x16xf32> to vector<4x16x16xf32>
    %40 = arith.subf %36, %39 : vector<4x16x16xf32>
    %41 = math.exp %40 : vector<4x16x16xf32>
    %cst_16 = arith.constant dense<0.000000e+00> : vector<16x16xf32>
    %42 = vector.multi_reduction <add>, %41, %cst_16 [0] : vector<4x16x16xf32> to vector<16x16xf32>
    %43 = vector.shape_cast %42 : vector<16x16xf32> to vector<1x16x16xf32>
    %44 = vector.broadcast %43 : vector<1x16x16xf32> to vector<4x16x16xf32>
    %45 = arith.divf %41, %44 : vector<4x16x16xf32>
    %46 = arith.mulf %30, %45 : vector<4x16x16xf32>
    %cst_17 = arith.constant dense<0.000000e+00> : vector<16x16xf32>
    %47 = vector.multi_reduction <add>, %46, %cst_17 [0] : vector<4x16x16xf32> to vector<16x16xf32>
    %c0_18 = arith.constant 0 : index
    %c0_19 = arith.constant 0 : index
    %48 = vector.load %arg5[%c0_18, %c0_19] : memref<4x1xf32, #tpu.memory_space<vmem>>, vector<4x1xf32>
    %49 = vector.shape_cast %48 : vector<4x1xf32> to vector<4x1x1xf32>
    %50 = vector.shape_cast %47 : vector<16x16xf32> to vector<1x16x16xf32>
    %51 = vector.broadcast %49 : vector<4x1x1xf32> to vector<4x16x16xf32>
    %52 = vector.broadcast %50 : vector<1x16x16xf32> to vector<4x16x16xf32>
    %53 = arith.mulf %51, %52 : vector<4x16x16xf32>
    %54 = arith.addf %17, %53 : vector<4x16x16xf32>
    %55 = tpu.iota {dimensions = array<i32: 0>} : vector<16x16xi32>
    %56 = tpu.iota {dimensions = array<i32: 1>} : vector<16x16xi32>
    %57 = arith.cmpi eq, %55, %56 : vector<16x16xi32>
    %58 = vector.shape_cast %57 : vector<16x16xi1> to vector<1x16x16xi1>
    %cst_20 = arith.constant -1.000000e+09 : f32
    %59 = vector.shape_cast %58 : vector<1x16x16xi1> to vector<1x16x16xi1>
    %60 = vector.broadcast %59 : vector<1x16x16xi1> to vector<4x16x16xi1>
    %61 = vector.broadcast %cst_20 : f32 to vector<4x16x16xf32>
    %62 = arith.select %60, %61, %54 : vector<4x16x16xi1>, vector<4x16x16xf32>
    %cst_21 = arith.constant dense<0xFF800000> : vector<4x16xf32>
    %63 = vector.multi_reduction <maximumf>, %62, %cst_21 [2] : vector<4x16x16xf32> to vector<4x16xf32>
    %64 = vector.shape_cast %63 : vector<4x16xf32> to vector<4x16x1xf32>
    %65 = vector.broadcast %64 : vector<4x16x1xf32> to vector<4x16x16xf32>
    %66 = arith.subf %62, %65 : vector<4x16x16xf32>
    %67 = math.exp %66 : vector<4x16x16xf32>
    %cst_22 = arith.constant dense<0.000000e+00> : vector<4x16xf32>
    %68 = vector.multi_reduction <add>, %67, %cst_22 [2] : vector<4x16x16xf32> to vector<4x16xf32>
    %69 = vector.shape_cast %68 : vector<4x16xf32> to vector<4x16x1xf32>
    %70 = vector.broadcast %69 : vector<4x16x1xf32> to vector<4x16x16xf32>
    %71 = arith.divf %67, %70 : vector<4x16x16xf32>
    %c0_23 = arith.constant 0 : index
    %c0_24 = arith.constant 0 : index
    %c0_25 = arith.constant 0 : index
    %72 = vector.load %arg10[%c0_23, %c0_24, %c0_25] : memref<4x16x16xf32, #tpu.memory_space<vmem>>, vector<4x16x16xf32>
    tpu.vector_store %arg10[%c0_23, %c0_24, %c0_25], %71 {strides = array<i32>} : memref<4x16x16xf32, #tpu.memory_space<vmem>>, vector<4x16x16xf32>,
    %73 = vector.shape_cast %8 : vector<16x256xf32> to vector<1x16x256xf32>
    %74 = vector.extract_strided_slice %9 {offsets = [0, 0, 0], sizes = [4, 1, 256], strides = [1, 1, 1]} : vector<6x1x256xf32> to vector<4x1x256xf32>
    %75 = vector.broadcast %73 : vector<1x16x256xf32> to vector<4x16x256xf32>
    %76 = vector.broadcast %74 : vector<4x1x256xf32> to vector<4x16x256xf32>
    %77 = arith.mulf %75, %76 : vector<4x16x256xf32>
    %78 = vector.extract_strided_slice %71 {offsets = [0, 0, 0], sizes = [1, 16, 16], strides = [1, 1, 1]} : vector<4x16x16xf32> to vector<1x16x16xf32>
    %79 = vector.shape_cast %78 : vector<1x16x16xf32> to vector<16x16xf32>
    %80 = vector.extract_strided_slice %77 {offsets = [0, 0, 0], sizes = [1, 16, 256], strides = [1, 1, 1]} : vector<4x16x256xf32> to vector<1x16x256xf32>
    %81 = vector.shape_cast %80 : vector<1x16x256xf32> to vector<16x256xf32>
    %cst_26 = arith.constant dense<0.000000e+00> : vector<16x256xf32>
    %82 = tpu.matmul %79, %81, %cst_26 {dimension_numbers = #tpu.dot_dimension_numbers<[1], [0], [0], [1], [0, 0, 1, 1], [], []>} : vector<16x16xf32>, vector<16x256xf32>, vector<16x256xf32> -> vector<16x256xf32>
    %83 = vector.extract_strided_slice %71 {offsets = [1, 0, 0], sizes = [1, 16, 16], strides = [1, 1, 1]} : vector<4x16x16xf32> to vector<1x16x16xf32>
    %84 = vector.shape_cast %83 : vector<1x16x16xf32> to vector<16x16xf32>
    %85 = vector.extract_strided_slice %77 {offsets = [1, 0, 0], sizes = [1, 16, 256], strides = [1, 1, 1]} : vector<4x16x256xf32> to vector<1x16x256xf32>
    %86 = vector.shape_cast %85 : vector<1x16x256xf32> to vector<16x256xf32>
    %cst_27 = arith.constant dense<0.000000e+00> : vector<16x256xf32>
    %87 = tpu.matmul %84, %86, %cst_27 {dimension_numbers = #tpu.dot_dimension_numbers<[1], [0], [0], [1], [0, 0, 1, 1], [], []>} : vector<16x16xf32>, vector<16x256xf32>, vector<16x256xf32> -> vector<16x256xf32>
    %88 = arith.addf %82, %87 : vector<16x256xf32>
    %89 = vector.extract_strided_slice %71 {offsets = [2, 0, 0], sizes = [1, 16, 16], strides = [1, 1, 1]} : vector<4x16x16xf32> to vector<1x16x16xf32>
    %90 = vector.shape_cast %89 : vector<1x16x16xf32> to vector<16x16xf32>
    %91 = vector.extract_strided_slice %77 {offsets = [2, 0, 0], sizes = [1, 16, 256], strides = [1, 1, 1]} : vector<4x16x256xf32> to vector<1x16x256xf32>
    %92 = vector.shape_cast %91 : vector<1x16x256xf32> to vector<16x256xf32>
    %cst_28 = arith.constant dense<0.000000e+00> : vector<16x256xf32>
    %93 = tpu.matmul %90, %92, %cst_28 {dimension_numbers = #tpu.dot_dimension_numbers<[1], [0], [0], [1], [0, 0, 1, 1], [], []>} : vector<16x16xf32>, vector<16x256xf32>, vector<16x256xf32> -> vector<16x256xf32>
    %94 = arith.addf %88, %93 : vector<16x256xf32>
    %95 = vector.extract_strided_slice %71 {offsets = [3, 0, 0], sizes = [1, 16, 16], strides = [1, 1, 1]} : vector<4x16x16xf32> to vector<1x16x16xf32>
    %96 = vector.shape_cast %95 : vector<1x16x16xf32> to vector<16x16xf32>
    %97 = vector.extract_strided_slice %77 {offsets = [3, 0, 0], sizes = [1, 16, 256], strides = [1, 1, 1]} : vector<4x16x256xf32> to vector<1x16x256xf32>
    %98 = vector.shape_cast %97 : vector<1x16x256xf32> to vector<16x256xf32>
    %cst_29 = arith.constant dense<0.000000e+00> : vector<16x256xf32>
    %99 = tpu.matmul %96, %98, %cst_29 {dimension_numbers = #tpu.dot_dimension_numbers<[1], [0], [0], [1], [0, 0, 1, 1], [], []>} : vector<16x16xf32>, vector<16x256xf32>, vector<16x256xf32> -> vector<16x256xf32>
    %100 = arith.addf %94, %99 : vector<16x256xf32>
    %c0_30 = arith.constant 0 : index
    %c0_31 = arith.constant 0 : index
    %101 = vector.load %arg6[%c0_30, %c0_31] : memref<256x256xf32, #tpu.memory_space<vmem>>, vector<256x256xf32>
    %cst_32 = arith.constant dense<0.000000e+00> : vector<16x256xf32>
    %102 = tpu.matmul %100, %101, %cst_32 {dimension_numbers = #tpu.dot_dimension_numbers<[1], [0], [0], [1], [0, 0, 1, 1], [], []>} : vector<16x256xf32>, vector<256x256xf32>, vector<16x256xf32> -> vector<16x256xf32>
    %c0_33 = arith.constant 0 : index
    %c0_34 = arith.constant 0 : index
    %103 = vector.load %arg7[%c0_33, %c0_34] : memref<1x256xf32, #tpu.memory_space<vmem>>, vector<1x256xf32>
    %104 = vector.broadcast %103 : vector<1x256xf32> to vector<16x256xf32>
    %105 = arith.addf %102, %104 : vector<16x256xf32>
    %c0_35 = arith.constant 0 : index
    %c0_36 = arith.constant 0 : index
    %106 = vector.load %arg9[%c0_35, %c0_36] : memref<16x256xf32, #tpu.memory_space<vmem>>, vector<16x256xf32>
    tpu.vector_store %arg9[%c0_35, %c0_36], %105 {strides = array<i32>} : memref<16x256xf32, #tpu.memory_space<vmem>>, vector<16x256xf32>,
    return
  }
}

</mosaic_0001>

<bundles_post_ra>
// kernel: tile.17
= control target key start
LH: loop header
LB: loop body
LE: loop exit
PB: predicated region body
PF: predicated region fallthrough
CT: control target
= control target key end

     0   :  { %s28_s0 = inlined_call_operand.vmem [shape: f32[16], index: 0, kind: input, shape index: {}]   ;;  %s29_s1 = inlined_call_operand.vmem [shape: f32[16,16], index: 1, kind: output, shape index: {}]  }
   0x1   :  { %v4_v0 = vld [vmem:[%s28_s0] ss:$0 sm:$0xff] }
   0x2   :  { %5 = vst [vmem:[%s29_s1] sm:$0xff] %v4_v0  ;;  %8 = vst [vmem:[%s29_s1 + $0x8] sm:$0xff] %v4_v0 }

// kernel: tile.18
= control target key start
LH: loop header
LB: loop body
LE: loop exit
PB: predicated region body
PF: predicated region fallthrough
CT: control target
= control target key end

     0   :  { %s7_s6 = smov 3  ;;  %s21_s9 = smov 3  ;;  %vm4_vm0 = vcmask 130048   ;;  %vm11_vm1 = vcmask 1048448   ;;  %vm18_vm2 = vcmask 917248   ;;  %vm25_vm3 = vcmask 786048   ;;  %s128_s0 = inlined_call_operand.vmem [shape: f32[16,16], index: 0, kind: input, shape index: {}]   ;;  %s129_s1 = inlined_call_operand.vmem [shape: f32[1,256], index: 1, kind: output, shape index: {}]  }
   0x1   :  { %v66_v0 = vld [vmem:[%s128_s0 + $0x7] ss:$8 sm:%s7_s6]   ;;  %s81_s10 = smov 112   ;;  %v68_v1 = vld [vmem:[%s128_s0 + $0x5] ss:$8 sm:%s21_s9]   ;;  %s14_s13 = smov 3 }
   0x2   :  { %9 = vrot.lane.b32.xlu0 %v66_v0, %s81_s10  ;;  %s82_s14 = smov 80   ;;  %v67_v2 = vld [vmem:[%s128_s0 + $0x6] ss:$8 sm:%s14_s13]   ;;  %s28_s17 = smov 3  ;;  %vm32_vm4 = vcmask 654848   ;;  %vm39_vm5 = vcmask 523648  }
   0x3   :  { %23 = vrot.lane.b32.xlu1 %v68_v1, %s82_s14  ;;  %v69_v3 = vld [vmem:[%s128_s0 + $0x4] ss:$8 sm:%s28_s17]   ;;  %s35_s20 = smov 3  ;;  %s42_s21 = smov 3  ;;  %vm46_vm6 = vcmask 392448   ;;  %vm53_vm7 = vcmask 261248  }
   0x4   :  { %s83_s22 = smov 96   ;;  %s84_s23 = smov 64   ;;  %v70_v4 = vld [vmem:[%s128_s0 + $0x3] ss:$8 sm:%s35_s20]   ;;  %v71_v5 = vld [vmem:[%s128_s0 + $0x2] ss:$8 sm:%s42_s21]  }
   0x5   :  { %s2_s26 = smov 3  ;;  %s49_s29 = smov 3 }
   0x6   :  { %16 = vrot.lane.b32.xlu0 %v67_v2, %s83_s22  ;;  %v3_v6 = vld [vmem:[%s128_s0] ss:$8 sm:%s2_s26]   ;;  %s85_s3 = smov 48   ;;  %s86_s4 = smov 32  }
   0x7   :  { %30 = vrot.lane.b32.xlu1 %v69_v3, %s84_s23  ;;  %5 = vst.msk [vmem:[#allocation0] ss:$8 sm:$0x3] %vm4_vm0, %v3_v6   ;;  %v72_v7 = vld [vmem:[%s128_s0 + $0x1] ss:$8 sm:%s49_s29]   ;;  %s87_s0 = smov 16  }
   0xa   :  { %37 = vrot.lane.b32.xlu0 %v70_v4, %s85_s3 }
   0xb   :  { %44 = vrot.lane.b32.xlu1 %v71_v5, %s86_s4 }
   0xe   :  { %51 = vrot.lane.b32.xlu0 %v72_v7, %s87_s0 }
  0x74   :  { %v10_v8 = vpop.permute.xlu0 %9  }
  0x75   :  { %12 = vst.msk [vmem:[#allocation0] ss:$8 sm:$0x3] %vm11_vm1, %v10_v8   ;;  %v24_v9 = vpop.permute.xlu1 %23  }
  0x78   :  { %v17_v10 = vpop.permute.xlu0 %16  }
  0x79   :  { %19 = vst.msk [vmem:[#allocation0] ss:$8 sm:$0x3] %vm18_vm2, %v17_v10   ;;  %v31_v11 = vpop.permute.xlu1 %30  }
  0x7a   :  { %26 = vst.msk [vmem:[#allocation0] ss:$8 sm:$0x3] %vm25_vm3, %v24_v9  }
  0x7b   :  { %33 = vst.msk [vmem:[#allocation0] ss:$8 sm:$0x3] %vm32_vm4, %v31_v11  }
  0x7c   :  { %v38_v12 = vpop.permute.xlu0 %37  }
  0x7d   :  { %40 = vst.msk [vmem:[#allocation0] ss:$8 sm:$0x3] %vm39_vm5, %v38_v12   ;;  %v45_v13 = vpop.permute.xlu1 %44  }
  0x7e   :  { %47 = vst.msk [vmem:[#allocation0] ss:$8 sm:$0x3] %vm46_vm6, %v45_v13  }
  0x80   :  { %v52_v14 = vpop.permute.xlu0 %51  }
  0x81   :  { %54 = vst.msk [vmem:[#allocation0] ss:$8 sm:$0x3] %vm53_vm7, %v52_v14  }
  0x88   :  { %v58_v15 = vld [vmem:[#allocation0] sm:$0x1]  ;;  %v62_v16 = vld [vmem:[#allocation0 + $0x8] sm:$0x1] }
  0x89   :  { %60 = vst [vmem:[%s129_s1] sm:$0x1] %v58_v15  ;;  %73 = vst [vmem:[%s129_s1 + $0x1] sm:$0x1] %v62_v16 }

// kernel: tile.26
= control target key start
LH: loop header
LB: loop body
LE: loop exit
PB: predicated region body
PF: predicated region fallthrough
CT: control target
= control target key end

     0   :  { %s22_s0 = inlined_call_operand.vmem [shape: f32[64], index: 0, kind: input, shape index: {}]   ;;  %s23_s1 = inlined_call_operand.vmem [shape: f32[4,64], index: 1, kind: output, shape index: {}]  }
   0x1   :  { %v4_v0 = vld [vmem:[%s22_s0] ss:$0 sm:$0xff] }
   0x2   :  { %5 = vst [vmem:[%s23_s1] sm:$0xf] %v4_v0 }

// kernel: tile.27
= control target key start
LH: loop header
LB: loop body
LE: loop exit
PB: predicated region body
PF: predicated region fallthrough
CT: control target
= control target key end

     0   :  { %s6_s8 = smov 3  ;;  %vm8_vm0 = vcmask 523264   ;;  %s30_s9 = smov 64   ;;  %vm15_vm1 = vcmask 1048064   ;;  %s50_s0 = inlined_call_operand.vmem [shape: f32[4,64], index: 0, kind: input, shape index: {}]   ;;  %s51_s1 = inlined_call_operand.vmem [shape: f32[1,256], index: 1, kind: output, shape index: {}]  }
   0x1   :  { %v4_v0 = vld [vmem:[%s50_s0] sm:$0xf]  ;;  %s11_s0 = smov 3 }
   0x2   :  { %5 = vst [vmem:[#allocation1] sm:$0xf] %v4_v0 }
   0x9   :  { %v12_v1 = vld [vmem:[#allocation1 + $0x1] ss:$2 sm:%s11_s0]   ;;  %v7_v2 = vld [vmem:[#allocation1] ss:$2 sm:%s6_s8]  }
   0xa   :  { %13 = vrot.lane.b32.xlu0 %v12_v1, %s30_s9  ;;  %9 = vst.msk [vmem:[#allocation0] ss:$8 sm:$0x3] %vm8_vm0, %v7_v2  }
  0x7c   :  { %v14_v3 = vpop.permute.xlu0 %13  }
  0x7d   :  { %16 = vst.msk [vmem:[#allocation0] ss:$8 sm:$0x3] %vm15_vm1, %v14_v3  }
  0x84   :  { %v20_v4 = vld [vmem:[#allocation0] sm:$0x1]  ;;  %v24_v5 = vld [vmem:[#allocation0 + $0x8] sm:$0x1] }
  0x85   :  { %22 = vst [vmem:[%s51_s1] sm:$0x1] %v20_v4  ;;  %28 = vst [vmem:[%s51_s1 + $0x1] sm:$0x1] %v24_v5 }

// kernel: _lambda_.1
= control target key start
LH: loop header
LB: loop body
LE: loop exit
PB: predicated region body
PF: predicated region fallthrough
CT: control target
= control target key end

     0   :  { %16 = vsyncpa [#allocation4], 0  ;;  %s3250_s0 = inlined_call_operand.vmem [shape: f32[16,256], index: 0, kind: input, shape index: {}]   ;;  %s3251_s1 = inlined_call_operand.vmem [shape: f32[256,768], index: 1, kind: input, shape index: {}]   ;;  %s3252_s2 = inlined_call_operand.vmem [shape: f32[1,768], index: 2, kind: input, shape index: {}]   ;;  %s3253_s3 = inlined_call_operand.vmem [shape: f32[6,1,256], index: 3, kind: input, shape index: {}]   ;;  %s3254_s4 = inlined_call_operand.vmem [shape: f32[4,16,16], index: 4, kind: input, shape index: {}]   ;;  %s3255_s5 = inlined_call_operand.vmem [shape: f32[4,1], index: 5, kind: input, shape index: {}]   ;;  %s3256_s6 = inlined_call_operand.vmem [shape: f32[256,256], index: 6, kind: input, shape index: {}]   ;;  %s3257_s7 = inlined_call_operand.vmem [shape: f32[1,256], index: 7, kind: input, shape index: {}]   ;;  %s3258_s8 = inlined_call_operand.vmem [shape: f32[2], index: 8, kind: input, shape index: {}]   ;;  %s3259_s9 = inlined_call_operand.vmem [shape: f32[16,256], index: 9, kind: output, shape index: {0}]   ;;  %s3260_s10 = inlined_call_operand.hbm [shape: f32[4,16,16], index: 10, kind: output, shape index: {1}]  }
   0x1   :  { %17 = vsyncpa [#allocation3], 0  ;;  %s40_s15 = sshll.u32 %s3258_s8, 4  ;;  %s41_s15 = int_to_ptr.vmem [resolvable:$true] %s40_s15 }
   0x2   :  { %s1931_s16 = scalar_lea.vmem %s41_s15, 16  ;;  %p1936_p1 = scmp.lt.s32.totalorder %s41_s15, %s41_s15 }
   0x3   :  { %p1932_p0 = scmp.ne.s32.totalorder %s41_s15, %s1931_s16  ;;  %p1937_p2 = scmp.lt.s32.totalorder %s1931_s16, %s1931_s16 }
   0x5   :  { %p1938_p3 = por %p1937_p2, %p1936_p1 }
   0x7   :  { %p1939_p4 = pnand %p1938_p3, %p1932_p0 }
   0x9   :  { %1942 = shalt.err (!%p1939_p4)
}
   0xa   :  { %s1969_s17 = smov [#allocation2]  }
   0xb   :  { %43 = dma.vmem_to_smem %s41_s15, 16, %s1969_s17, [#allocation4]  }
   0xc   :  { %1965 = dma.done.wait [#allocation4], 16  }
   0xd   :  { %1966 = vsyncadd [#allocation4], 4294967280 }
   0xe   :  { %47 = sfence }
   0xf   :  { %v55_v0 = vld [vmem:[%s3251_s1 + $0x18] sm:$0xff]  ;;  %v61_v1 = vld [vmem:[%s3251_s1 + $0x48] sm:$0xff]  ;;  %v54_v2 = vld [vmem:[%s3251_s1 + $0x10] sm:$0xff]  ;;  %s730_s23 = sld [smem:[#allocation2]]  ;;  %vm764_vm0 = vcmask 130048   ;;  %s1973_s11 = smov [#allocation5]  }
  0x10   :  { %v1646_v3 = vpack.c.bf16 %v61_v1, %v55_v0  ;;  %v60_v4 = vld [vmem:[%s3251_s1 + $0x40] sm:$0xff]  ;;  %v67_v5 = vld [vmem:[%s3251_s1 + $0x78] sm:$0xff]  ;;  %v73_v6 = vld [vmem:[%s3251_s1 + $0xa8] sm:$0xff]  ;;  %s1558_s12 = sshll.u32 %s1973_s11, 4  ;;  %s1559_s12 = int_to_ptr.vmem [resolvable:$true] %s1558_s12 }
  0x11   :  { %v1648_v7 = vpack.c.bf16 %v60_v4, %v54_v2  ;;  %v1650_v8 = vpack.c.bf16 %v73_v6, %v67_v5  ;;  %v66_v9 = vld [vmem:[%s3251_s1 + $0x70] sm:$0xff]  ;;  %v72_v10 = vld [vmem:[%s3251_s1 + $0xa0] sm:$0xff]  ;;  %v79_v11 = vld [vmem:[%s3251_s1 + $0xd8] sm:$0xff]  ;;  %p1948_p6 = scmp.lt.s32.totalorder %s1559_s12, %s1559_s12 }
  0x12   :  { %1647 = vmatprep.subr.bf16.mxu1 %v1646_v3  ;;  %v85_v12 = vld [vmem:[%s3251_s1 + $0x108] sm:$0xff]  ;;  %v1652_v13 = vpack.c.bf16 %v72_v10, %v66_v9  ;;  %v59_v15 = vld [vmem:[%s3251_s1 + $0x38] sm:$0xff]  ;;  %v52_v16 = vld [vmem:[%s3251_s1] sm:$0xff] }
  0x13   :  { %1649 = vmatpush1.bf16.msra.mxu1 %v1648_v7  ;;  %v53_v14 = vld [vmem:[%s3251_s1 + $0x8] sm:$0xff]  ;;  %v1654_v17 = vpack.c.bf16 %v85_v12, %v79_v11  ;;  %v78_v18 = vld [vmem:[%s3251_s1 + $0xd0] sm:$0xff]  ;;  %v84_v19 = vld [vmem:[%s3251_s1 + $0x100] sm:$0xff] }
  0x14   :  { %1651 = vmatprep.subr.bf16.mxu1 %v1650_v8  ;;  %v1582_v20 = vpack.c.bf16 %v59_v15, %v53_v14  ;;  %v58_v21 = vld [vmem:[%s3251_s1 + $0x30] sm:$0xff]  ;;  %v91_v23 = vld [vmem:[%s3251_s1 + $0x138] sm:$0xff]  ;;  %v97_v24 = vld [vmem:[%s3251_s1 + $0x168] sm:$0xff]  ;;  %v1656_v29 = vpack.c.bf16 %v84_v19, %v78_v18 }
  0x15   :  { %v1584_v22 = vpack.c.bf16 %v58_v21, %v52_v16  ;;  %v65_v25 = vld [vmem:[%s3251_s1 + $0x68] sm:$0xff]  ;;  %v71_v26 = vld [vmem:[%s3251_s1 + $0x98] sm:$0xff]  ;;  %v64_v27 = vld [vmem:[%s3251_s1 + $0x60] sm:$0xff]  ;;  %v1658_v34 = vpack.c.bf16 %v97_v24, %v91_v23 }
  0x16   :  { %1583 = vmatprep.subr.bf16.mxu0 %v1582_v20  ;;  %v70_v28 = vld [vmem:[%s3251_s1 + $0x90] sm:$0xff]  ;;  %v96_v31 = vld [vmem:[%s3251_s1 + $0x160] sm:$0xff]  ;;  %v1586_v32 = vpack.c.bf16 %v71_v26, %v65_v25  ;;  %v103_v35 = vld [vmem:[%s3251_s1 + $0x198] sm:$0xff] }
  0x17   :  { %1653 = vmatpush1.bf16.msra.mxu1 %v1652_v13  ;;  %1585 = vmatpush1.bf16.msra.mxu0 %v1584_v22  ;;  %v90_v30 = vld [vmem:[%s3251_s1 + $0x130] sm:$0xff]  ;;  %v1588_v33 = vpack.c.bf16 %v70_v28, %v64_v27  ;;  %v77_v36 = vld [vmem:[%s3251_s1 + $0xc8] sm:$0xff]  ;;  %v83_v37 = vld [vmem:[%s3251_s1 + $0xf8] sm:$0xff] }
  0x18   :  { %1655 = vmatprep.subr.bf16.mxu1 %v1654_v17  ;;  %1587 = vmatprep.subr.bf16.mxu0 %v1586_v32  ;;  %v109_v38 = vld [vmem:[%s3251_s1 + $0x1c8] sm:$0xff]  ;;  %v1590_v39 = vpack.c.bf16 %v83_v37, %v77_v36  ;;  %v76_v40 = vld [vmem:[%s3251_s1 + $0xc0] sm:$0xff]  ;;  %v82_v41 = vld [vmem:[%s3251_s1 + $0xf0] sm:$0xff]  ;;  %v1660_v42 = vpack.c.bf16 %v96_v31, %v90_v30 }
  0x19   :  { %v102_v43 = vld [vmem:[%s3251_s1 + $0x190] sm:$0xff]  ;;  %v1592_v44 = vpack.c.bf16 %v82_v41, %v76_v40  ;;  %v89_v45 = vld [vmem:[%s3251_s1 + $0x128] sm:$0xff]  ;;  %v95_v46 = vld [vmem:[%s3251_s1 + $0x158] sm:$0xff]  ;;  %v1662_v47 = vpack.c.bf16 %v109_v38, %v103_v35 }
  0x1a   :  { %v108_v48 = vld [vmem:[%s3251_s1 + $0x1c0] sm:$0xff]  ;;  %v1594_v49 = vpack.c.bf16 %v95_v46, %v89_v45  ;;  %v94_v51 = vld [vmem:[%s3251_s1 + $0x150] sm:$0xff]  ;;  %v115_v52 = vld [vmem:[%s3251_s1 + $0x1f8] sm:$0xff] }
  0x1b   :  { %1657 = vmatpush1.bf16.msra.mxu1 %v1656_v29  ;;  %1589 = vmatpush1.bf16.msra.mxu0 %v1588_v33  ;;  %v88_v50 = vld [vmem:[%s3251_s1 + $0x120] sm:$0xff]  ;;  %v121_v53 = vld [vmem:[%s3251_s1 + $0x228] sm:$0xff]  ;;  %v107_v55 = vld [vmem:[%s3251_s1 + $0x1b8] sm:$0xff]  ;;  %v1664_v56 = vpack.c.bf16 %v108_v48, %v102_v43 }
  0x1c   :  { %1659 = vmatprep.subr.bf16.mxu1 %v1658_v34  ;;  %1591 = vmatprep.subr.bf16.mxu0 %v1590_v39  ;;  %v101_v54 = vld [vmem:[%s3251_s1 + $0x188] sm:$0xff]  ;;  %v114_v57 = vld [vmem:[%s3251_s1 + $0x1f0] sm:$0xff]  ;;  %v120_v58 = vld [vmem:[%s3251_s1 + $0x220] sm:$0xff]  ;;  %v1596_v59 = vpack.c.bf16 %v94_v51, %v88_v50  ;;  %v1666_v60 = vpack.c.bf16 %v121_v53, %v115_v52 }
  0x1d   :  { %v127_v61 = vld [vmem:[%s3251_s1 + $0x258] sm:$0xff]  ;;  %v1598_v62 = vpack.c.bf16 %v107_v55, %v101_v54  ;;  %v100_v63 = vld [vmem:[%s3251_s1 + $0x180] sm:$0xff]  ;;  %v106_v0 = vld [vmem:[%s3251_s1 + $0x1b0] sm:$0xff]  ;;  %v1668_v4 = vpack.c.bf16 %v120_v58, %v114_v57 }
  0x1e   :  { %v133_v1 = vld [vmem:[%s3251_s1 + $0x288] sm:$0xff]  ;;  %v119_v3 = vld [vmem:[%s3251_s1 + $0x218] sm:$0xff]  ;;  %v126_v5 = vld [vmem:[%s3251_s1 + $0x250] sm:$0xff]  ;;  %v1600_v7 = vpack.c.bf16 %v106_v0, %v100_v63 }
  0x1f   :  { %1661 = vmatpush1.bf16.msra.mxu1 %v1660_v42  ;;  %1593 = vmatpush1.bf16.msra.mxu0 %v1592_v44  ;;  %v113_v2 = vld [vmem:[%s3251_s1 + $0x1e8] sm:$0xff]  ;;  %v132_v6 = vld [vmem:[%s3251_s1 + $0x280] sm:$0xff]  ;;  %v1670_v8 = vpack.c.bf16 %v133_v1, %v127_v61  ;;  %v139_v9 = vld [vmem:[%s3251_s1 + $0x2b8] sm:$0xff] }
  0x20   :  { %1663 = vmatprep.subr.bf16.mxu1 %v1662_v47  ;;  %1595 = vmatprep.subr.bf16.mxu0 %v1594_v49  ;;  %v1602_v10 = vpack.c.bf16 %v119_v3, %v113_v2  ;;  %v112_v11 = vld [vmem:[%s3251_s1 + $0x1e0] sm:$0xff]  ;;  %v118_v12 = vld [vmem:[%s3251_s1 + $0x210] sm:$0xff]  ;;  %v145_v13 = vld [vmem:[%s3251_s1 + $0x2e8] sm:$0xff]  ;;  %v1672_v16 = vpack.c.bf16 %v132_v6, %v126_v5 }
  0x21   :  { %v125_v14 = vld [vmem:[%s3251_s1 + $0x248] sm:$0xff]  ;;  %v131_v15 = vld [vmem:[%s3251_s1 + $0x278] sm:$0xff]  ;;  %v138_v17 = vld [vmem:[%s3251_s1 + $0x2b0] sm:$0xff]  ;;  %v1604_v19 = vpack.c.bf16 %v118_v12, %v112_v11  ;;  %v1674_v20 = vpack.c.bf16 %v145_v13, %v139_v9 }
  0x22   :  { %v144_v18 = vld [vmem:[%s3251_s1 + $0x2e0] sm:$0xff]  ;;  %v151_v21 = vld [vmem:[%s3251_s1 + $0x318] sm:$0xff]  ;;  %v1606_v22 = vpack.c.bf16 %v131_v15, %v125_v14  ;;  %v130_v24 = vld [vmem:[%s3251_s1 + $0x270] sm:$0xff] }
  0x23   :  { %1665 = vmatpush1.bf16.msra.mxu1 %v1664_v56  ;;  %1597 = vmatpush1.bf16.msra.mxu0 %v1596_v59  ;;  %v124_v23 = vld [vmem:[%s3251_s1 + $0x240] sm:$0xff]  ;;  %v157_v25 = vld [vmem:[%s3251_s1 + $0x348] sm:$0xff]  ;;  %v143_v27 = vld [vmem:[%s3251_s1 + $0x2d8] sm:$0xff]  ;;  %v1676_v28 = vpack.c.bf16 %v144_v18, %v138_v17 }
  0x24   :  { %1667 = vmatprep.subr.bf16.mxu1 %v1666_v60  ;;  %1599 = vmatprep.subr.bf16.mxu0 %v1598_v62  ;;  %v137_v26 = vld [vmem:[%s3251_s1 + $0x2a8] sm:$0xff]  ;;  %v150_v29 = vld [vmem:[%s3251_s1 + $0x310] sm:$0xff]  ;;  %v156_v30 = vld [vmem:[%s3251_s1 + $0x340] sm:$0xff]  ;;  %v1608_v31 = vpack.c.bf16 %v130_v24, %v124_v23  ;;  %v1678_v32 = vpack.c.bf16 %v157_v25, %v151_v21 }
  0x25   :  { %v163_v33 = vld [vmem:[%s3251_s1 + $0x378] sm:$0xff]  ;;  %v1610_v34 = vpack.c.bf16 %v143_v27, %v137_v26  ;;  %v136_v35 = vld [vmem:[%s3251_s1 + $0x2a0] sm:$0xff]  ;;  %v142_v36 = vld [vmem:[%s3251_s1 + $0x2d0] sm:$0xff]  ;;  %v1680_v40 = vpack.c.bf16 %v156_v30, %v150_v29 }
  0x26   :  { %v169_v37 = vld [vmem:[%s3251_s1 + $0x3a8] sm:$0xff]  ;;  %v155_v39 = vld [vmem:[%s3251_s1 + $0x338] sm:$0xff]  ;;  %v162_v41 = vld [vmem:[%s3251_s1 + $0x370] sm:$0xff]  ;;  %v1612_v43 = vpack.c.bf16 %v142_v36, %v136_v35 }
  0x27   :  { %1669 = vmatpush1.bf16.msra.mxu1 %v1668_v4  ;;  %1601 = vmatpush1.bf16.msra.mxu0 %v1600_v7  ;;  %v149_v38 = vld [vmem:[%s3251_s1 + $0x308] sm:$0xff]  ;;  %v168_v42 = vld [vmem:[%s3251_s1 + $0x3a0] sm:$0xff]  ;;  %v1682_v44 = vpack.c.bf16 %v169_v37, %v163_v33  ;;  %v175_v45 = vld [vmem:[%s3251_s1 + $0x3d8] sm:$0xff] }
  0x28   :  { %1671 = vmatprep.subr.bf16.mxu1 %v1670_v8  ;;  %1603 = vmatprep.subr.bf16.mxu0 %v1602_v10  ;;  %v1614_v46 = vpack.c.bf16 %v155_v39, %v149_v38  ;;  %v148_v47 = vld [vmem:[%s3251_s1 + $0x300] sm:$0xff]  ;;  %v154_v48 = vld [vmem:[%s3251_s1 + $0x330] sm:$0xff]  ;;  %v181_v49 = vld [vmem:[%s3251_s1 + $0x408] sm:$0xff]  ;;  %v1684_v52 = vpack.c.bf16 %v168_v42, %v162_v41 }
  0x29   :  { %v161_v50 = vld [vmem:[%s3251_s1 + $0x368] sm:$0xff]  ;;  %v167_v51 = vld [vmem:[%s3251_s1 + $0x398] sm:$0xff]  ;;  %v174_v53 = vld [vmem:[%s3251_s1 + $0x3d0] sm:$0xff]  ;;  %v1616_v55 = vpack.c.bf16 %v154_v48, %v148_v47  ;;  %v1686_v56 = vpack.c.bf16 %v181_v49, %v175_v45 }
  0x2a   :  { %v180_v54 = vld [vmem:[%s3251_s1 + $0x400] sm:$0xff]  ;;  %v187_v57 = vld [vmem:[%s3251_s1 + $0x438] sm:$0xff]  ;;  %v1618_v58 = vpack.c.bf16 %v167_v51, %v161_v50  ;;  %v166_v60 = vld [vmem:[%s3251_s1 + $0x390] sm:$0xff] }
  0x2b   :  { %1673 = vmatpush1.bf16.msra.mxu1 %v1672_v16  ;;  %1605 = vmatpush1.bf16.msra.mxu0 %v1604_v19  ;;  %v160_v59 = vld [vmem:[%s3251_s1 + $0x360] sm:$0xff]  ;;  %v193_v61 = vld [vmem:[%s3251_s1 + $0x468] sm:$0xff]  ;;  %v179_v63 = vld [vmem:[%s3251_s1 + $0x3f8] sm:$0xff]  ;;  %v1688_v1 = vpack.c.bf16 %v180_v54, %v174_v53 }
  0x2c   :  { %1675 = vmatprep.subr.bf16.mxu1 %v1674_v20  ;;  %1607 = vmatprep.subr.bf16.mxu0 %v1606_v22  ;;  %v173_v62 = vld [vmem:[%s3251_s1 + $0x3c8] sm:$0xff]  ;;  %v186_v2 = vld [vmem:[%s3251_s1 + $0x430] sm:$0xff]  ;;  %v192_v3 = vld [vmem:[%s3251_s1 + $0x460] sm:$0xff]  ;;  %v1620_v4 = vpack.c.bf16 %v166_v60, %v160_v59  ;;  %v1690_v5 = vpack.c.bf16 %v193_v61, %v187_v57 }
  0x2d   :  { %v2301_v0 = vld [vmem:[%s3250_s0 + $0x8] sm:$0xff]  ;;  %v199_v6 = vld [vmem:[%s3251_s1 + $0x498] sm:$0xff]  ;;  %v1622_v7 = vpack.c.bf16 %v179_v63, %v173_v62  ;;  %v172_v8 = vld [vmem:[%s3251_s1 + $0x3c0] sm:$0xff]  ;;  %v1692_v13 = vpack.c.bf16 %v192_v3, %v186_v2 }
  0x2e   :  { %v178_v9 = vld [vmem:[%s3251_s1 + $0x3f0] sm:$0xff]  ;;  %v205_v10 = vld [vmem:[%s3251_s1 + $0x4c8] sm:$0xff]  ;;  %v191_v12 = vld [vmem:[%s3251_s1 + $0x458] sm:$0xff]  ;;  %417 = vmatprep.mubr.f32.mxu1 %v2301_v0  ;;  %340 = vmatprep.mubr.f32.mxu0 %v2301_v0 }
  0x2f   :  { %1677 = vmatpush1.bf16.msra.mxu1 %v1676_v28  ;;  %1609 = vmatpush1.bf16.msra.mxu0 %v1608_v31  ;;  %v185_v11 = vld [vmem:[%s3251_s1 + $0x428] sm:$0xff]  ;;  %v198_v14 = vld [vmem:[%s3251_s1 + $0x490] sm:$0xff]  ;;  %v204_v15 = vld [vmem:[%s3251_s1 + $0x4c0] sm:$0xff]  ;;  %v1624_v16 = vpack.c.bf16 %v178_v9, %v172_v8  ;;  %v1694_v17 = vpack.c.bf16 %v205_v10, %v199_v6  ;;  %v1970_v6 = vmov 0   ;;  %v1971_v8 = vmov 1966171168  }
  0x30   :  { %1679 = vmatprep.subr.bf16.mxu1 %v1678_v32  ;;  %1611 = vmatprep.subr.bf16.mxu0 %v1610_v34  ;;  %v211_v18 = vld [vmem:[%s3251_s1 + $0x4f8] sm:$0xff]  ;;  %v1626_v19 = vpack.c.bf16 %v191_v12, %v185_v11  ;;  %v184_v20 = vld [vmem:[%s3251_s1 + $0x420] sm:$0xff]  ;;  %v190_v21 = vld [vmem:[%s3251_s1 + $0x450] sm:$0xff]  ;;  %v1696_v25 = vpack.c.bf16 %v204_v15, %v198_v14  ;;  %v860_v9 = vunpack.c.l.s4 %v1971_v8 }
  0x31   :  { %v217_v22 = vld [vmem:[%s3251_s1 + $0x528] sm:$0xff]  ;;  %v203_v24 = vld [vmem:[%s3251_s1 + $0x4b8] sm:$0xff]  ;;  %v210_v26 = vld [vmem:[%s3251_s1 + $0x4f0] sm:$0xff]  ;;  %v1628_v28 = vpack.c.bf16 %v190_v21, %v184_v20  ;;  %1878 = vset.pattern.permute.xlu1 %v1970_v6  ;;  %1877 = vset.pattern.permute.xlu0 %v1970_v6 }
  0x32   :  { %v197_v23 = vld [vmem:[%s3251_s1 + $0x488] sm:$0xff]  ;;  %v216_v27 = vld [vmem:[%s3251_s1 + $0x520] sm:$0xff]  ;;  %v1698_v29 = vpack.c.bf16 %v217_v22, %v211_v18  ;;  %v223_v30 = vld [vmem:[%s3251_s1 + $0x558] sm:$0xff]  ;;  %v861_v11 = vunpack.c.0.s8 %v860_v9 }
  0x33   :  { %1681 = vmatpush1.bf16.msra.mxu1 %v1680_v40  ;;  %1613 = vmatpush1.bf16.msra.mxu0 %v1612_v43  ;;  %v1630_v31 = vpack.c.bf16 %v203_v24, %v197_v23  ;;  %v196_v32 = vld [vmem:[%s3251_s1 + $0x480] sm:$0xff]  ;;  %v202_v33 = vld [vmem:[%s3251_s1 + $0x4b0] sm:$0xff]  ;;  %v229_v34 = vld [vmem:[%s3251_s1 + $0x588] sm:$0xff]  ;;  %v1700_v37 = vpack.c.bf16 %v216_v27, %v210_v26 }
  0x34   :  { %1683 = vmatprep.subr.bf16.mxu1 %v1682_v44  ;;  %1615 = vmatprep.subr.bf16.mxu0 %v1614_v46  ;;  %v209_v35 = vld [vmem:[%s3251_s1 + $0x4e8] sm:$0xff]  ;;  %v215_v36 = vld [vmem:[%s3251_s1 + $0x518] sm:$0xff]  ;;  %v222_v38 = vld [vmem:[%s3251_s1 + $0x550] sm:$0xff]  ;;  %v1632_v40 = vpack.c.bf16 %v202_v33, %v196_v32  ;;  %v1702_v41 = vpack.c.bf16 %v229_v34, %v223_v30 }
  0x35   :  { %v228_v39 = vld [vmem:[%s3251_s1 + $0x580] sm:$0xff]  ;;  %v235_v42 = vld [vmem:[%s3251_s1 + $0x5b8] sm:$0xff]  ;;  %v1634_v43 = vpack.c.bf16 %v215_v36, %v209_v35  ;;  %v214_v45 = vld [vmem:[%s3251_s1 + $0x510] sm:$0xff] }
  0x36   :  { %v208_v44 = vld [vmem:[%s3251_s1 + $0x4e0] sm:$0xff]  ;;  %v241_v46 = vld [vmem:[%s3251_s1 + $0x5e8] sm:$0xff]  ;;  %v227_v48 = vld [vmem:[%s3251_s1 + $0x578] sm:$0xff]  ;;  %v1704_v49 = vpack.c.bf16 %v228_v39, %v222_v38 }
  0x37   :  { %1685 = vmatpush1.bf16.msra.mxu1 %v1684_v52  ;;  %1617 = vmatpush1.bf16.msra.mxu0 %v1616_v55  ;;  %v221_v47 = vld [vmem:[%s3251_s1 + $0x548] sm:$0xff]  ;;  %v234_v50 = vld [vmem:[%s3251_s1 + $0x5b0] sm:$0xff]  ;;  %v1636_v51 = vpack.c.bf16 %v214_v45, %v208_v44  ;;  %v1706_v52 = vpack.c.bf16 %v241_v46, %v235_v42  ;;  %v240_v53 = vld [vmem:[%s3251_s1 + $0x5e0] sm:$0xff] }
  0x38   :  { %1687 = vmatprep.subr.bf16.mxu1 %v1686_v56  ;;  %1619 = vmatprep.subr.bf16.mxu0 %v1618_v58  ;;  %v1638_v54 = vpack.c.bf16 %v227_v48, %v221_v47  ;;  %v220_v55 = vld [vmem:[%s3251_s1 + $0x540] sm:$0xff]  ;;  %v226_v56 = vld [vmem:[%s3251_s1 + $0x570] sm:$0xff]  ;;  %v233_v57 = vld [vmem:[%s3251_s1 + $0x5a8] sm:$0xff]  ;;  %v1708_v59 = vpack.c.bf16 %v240_v53, %v234_v50 }
  0x39   :  { %v239_v58 = vld [vmem:[%s3251_s1 + $0x5d8] sm:$0xff]  ;;  %v1640_v60 = vpack.c.bf16 %v226_v56, %v220_v55  ;;  %v232_v62 = vld [vmem:[%s3251_s1 + $0x5a0] sm:$0xff]  ;;  %v238_v63 = vld [vmem:[%s3251_s1 + $0x5d0] sm:$0xff] }
  0x3a   :  { %v1642_v61 = vpack.c.bf16 %v239_v58, %v233_v57  ;;  %v1644_v2 = vpack.c.bf16 %v238_v63, %v232_v62  ;;  %v2433_v3 = vld [vmem:[%s3250_s0 + $0x18] sm:$0xff]  ;;  %v2465_v23 = vld [vmem:[%s3252_s2] sm:$0x3f]  ;;  %s1943_s2 = scalar_lea.vmem %s1559_s12, 1024 }
  0x3b   :  { %1689 = vmatpush1.bf16.msra.mxu1 %v1688_v1  ;;  %1621 = vmatpush1.bf16.msra.mxu0 %v1620_v4  ;;  %v2428_v1 = vld [vmem:[%s3250_s0] sm:$0xff]  ;;  %v2440_v4 = vld [vmem:[%s3250_s0 + $0x10] sm:$0xff]  ;;  %p1944_p5 = scmp.ne.s32.totalorder %s1559_s12, %s1943_s2  ;;  %p1949_p7 = scmp.lt.s32.totalorder %s1943_s2, %s1943_s2 }
  0x3c   :  { %1691 = vmatprep.subr.bf16.mxu1 %v1690_v5  ;;  %1623 = vmatprep.subr.bf16.mxu0 %v1622_v7  ;;  %v246_v5 = vlaneseq  ;;  %v1573_v7 = vld.sshfl [vmem:[%s3255_s5] sm:$0x33 pattern:$0x75316420] }
  0x3d   :  { %v858_v12 = vcombine.high %v1573_v7, %v1573_v7  ;;  %p1950_p8 = por %p1949_p7, %p1948_p6 }
  0x3e   :  { %v2451_v10 = vshrl.u32 %v246_v5, 7 }
  0x3f   :  { %1693 = vmatpush1.bf16.msra.mxu1 %v1692_v13  ;;  %1625 = vmatpush1.bf16.msra.mxu0 %v1624_v16  ;;  %p1951_p9 = pnand %p1950_p8, %p1944_p5 }
  0x40   :  { %1695 = vmatprep.subr.bf16.mxu1 %v1694_v17  ;;  %1627 = vmatprep.subr.bf16.mxu0 %v1626_v19  ;;  %v864_v13 = vsub.s32 %v861_v11, %v2451_v10  ;;  %v2455_v14 = vsub.s32 0, %v2451_v10  ;;  %v256_v22 = vsub.s32 2, %v2451_v10  ;;  %v260_v24 = vsub.s32 3, %v2451_v10 }
  0x42   :  { %v872_v15 = vrot.slane %v858_v12, %v864_v13  ;;  %v257_v27 = vrot.slane %v2465_v23, %v256_v22  ;;  %v261_v30 = vrot.slane %v2465_v23, %v260_v24  ;;  %v249_v44 = vrot.slane %v2465_v23, %v2455_v14  ;;  %v512_v22 = vld [vmem:[%s3253_s3 + $0xa] sm:$0x3] }
  0x43   :  { %1697 = vmatpush1.bf16.msra.mxu1 %v1696_v25  ;;  %1629 = vmatpush1.bf16.msra.mxu0 %v1628_v28  ;;  %v2469_v25 = vsub.s32 1, %v2451_v10 }
  0x44   :  { %1699 = vmatprep.subr.bf16.mxu1 %v1698_v29  ;;  %1631 = vmatprep.subr.bf16.mxu0 %v1630_v31  ;;  %v874_v17 = vcombine.high %v872_v15, %v872_v15  ;;  %v882_v18 = vrot.slane %v872_v15, %v2455_v14  ;;  %v507_v29 = vld [vmem:[%s3253_s3] sm:$0x3]  ;;  %v511_v15 = vld [vmem:[%s3253_s3 + $0x8] sm:$0x3] }
  0x45   :  { %v253_v31 = vrot.slane %v2465_v23, %v2469_v25  ;;  %v2479_v34 = vrot.slane %v507_v29, %v2469_v25  ;;  %v2488_v50 = vrot.slane %v507_v29, %v2455_v14  ;;  %v562_v29 = vrot.slane %v512_v22, %v2455_v14 }
  0x46   :  { %896 = vperm.xlu0 %1877, %v882_v18   ;;  %v890_v21 = vrot.slane %v874_v17, %v2455_v14  ;;  %v558_v18 = vrot.slane %v511_v15, %v2469_v25 }
  0x47   :  { %1701 = vmatpush1.bf16.msra.mxu1 %v1700_v37  ;;  %1633 = vmatpush1.bf16.msra.mxu0 %v1632_v40 }
  0x48   :  { %1703 = vmatprep.subr.bf16.mxu1 %v1702_v41  ;;  %1635 = vmatprep.subr.bf16.mxu0 %v1634_v43 }
  0x4b   :  { %1705 = vmatpush1.bf16.msra.mxu1 %v1704_v49  ;;  %1637 = vmatpush1.bf16.msra.mxu0 %v1636_v51  ;;  %v508_v51 = vld [vmem:[%s3253_s3 + $0x2] sm:$0x3] }
  0x4c   :  { %1707 = vmatprep.subr.bf16.mxu1 %v1706_v52  ;;  %1639 = vmatprep.subr.bf16.mxu0 %v1638_v54  ;;  %v2496_v55 = vrot.slane %v508_v51, %v2469_v25  ;;  %v2500_v57 = vrot.slane %v508_v51, %v2455_v14  ;;  %v80_v51 = vld [vmem:[%s3251_s1 + $0xe0] sm:$0xff] }
  0x4f   :  { %1709 = vmatpush1.bf16.msra.mxu1 %v1708_v59  ;;  %1641 = vmatpush1.bf16.msra.mxu0 %v1640_v60  ;;  %v509_v59 = vld [vmem:[%s3253_s3 + $0x4] sm:$0x3] }
  0x50   :  { %1643 = vmatprep.subr.bf16.mxu0 %v1642_v61  ;;  %v2510_v62 = vrot.slane %v509_v59, %v2469_v25 }
  0x52   :  { %418 = vmatmul.mubr.f32.vlgmr.msra.gmra.mrb[0].mxu1 %v2428_v1 }
  0x53   :  { %423 = vmatprep.mubr.f32.mxu1 %v2433_v3  ;;  %1645 = vmatpush1.bf16.msra.mxu0 %v1644_v2  ;;  %v2514_v2 = vrot.slane %v509_v59, %v2455_v14  ;;  %v92_v59 = vld [vmem:[%s3251_s1 + $0x140] sm:$0xff] }
  0x56   :  { %424 = vmatmul.mubr.f32.gmra.mrb[2].mxu1 %v2440_v4  ;;  %341 = vmatmul.mubr.f32.vlgmr.msra.gmra.mrb[0].mxu0 %v2428_v1 }
  0x57   :  { %346 = vmatprep.mubr.f32.mxu0 %v2433_v3 }
  0x5a   :  { %347 = vmatmul.mubr.f32.gmra.mrb[2].mxu0 %v2440_v4 }
  0x5b   :  { %494 = vmatprep.mubr.f32.mxu0 %v2301_v0  ;;  %v865_v0 = vrot.slane %v1573_v7, %v864_v13  ;;  %v510_v7 = vld [vmem:[%s3253_s3 + $0x6] sm:$0x3] }
  0x5c   :  { %v2524_v11 = vrot.slane %v510_v7, %v2469_v25  ;;  %v2528_v13 = vrot.slane %v510_v7, %v2455_v14 }
  0x5d   :  { %v873_v16 = vcombine.high %v865_v0, %v865_v0  ;;  %v878_v20 = vrot.slane %v865_v0, %v2455_v14 }
  0x5f   :  { %v886_v19 = vrot.slane %v873_v16, %v2455_v14  ;;  %892 = vperm.xlu0 %1877, %v878_v20   ;;  %v554_v20 = vrot.slane %v511_v15, %v2455_v14  ;;  %v123_v15 = vld [vmem:[%s3251_s1 + $0x238] sm:$0xff] }
  0x61   :  { %900 = vperm.xlu1 %1878, %v886_v19  }
  0x65   :  { %904 = vperm.xlu1 %1878, %v890_v21  }
 0x125   :  { %v419_v26 = vpop.f32.mrb[0].mxu1 }
 0x126   :  { %v421_v28 = vpop.f32.mrb[1].mxu1  ;;  %v420_v35 = vadd.f32 %v419_v26, %v257_v27 }
 0x127   :  { %v422_v39 = vadd.f32 %v421_v28, %v261_v30 }
 0x129   :  { %v425_v32 = vpop.f32.mrb[2].mxu1  ;;  %v342_v33 = vpop.f32.mrb[0].mxu0 }
 0x12a   :  { %v426_v36 = vadd.f32 %v425_v32, %v257_v27  ;;  %v427_v37 = vpop.f32.mrb[3].mxu1  ;;  %v344_v38 = vpop.f32.mrb[1].mxu0  ;;  %v343_v49 = vadd.f32 %v342_v33, %v249_v44  ;;  %v566_v27 = vrot.slane %v512_v22, %v2469_v25 }
 0x12b   :  { %v428_v40 = vadd.f32 %v427_v37, %v261_v30  ;;  %v2481_v41 = vadd.f32 %v344_v38, %v253_v31  ;;  %v56_v37 = vld [vmem:[%s3251_s1 + $0x20] sm:$0xff] }
 0x12c   :  { %v1776_v42 = vpack.c.bf16 %v426_v36, %v420_v35  ;;  %v579_v54 = vmul.f32 %v2488_v50, %v343_v49  ;;  %v583_v60 = vmul.f32 %v2500_v57, %v343_v49  ;;  %v587_v8 = vmul.f32 %v2514_v2, %v343_v49  ;;  %v57_v35 = vld [vmem:[%s3251_s1 + $0x28] sm:$0xff]  ;;  %v63_v36 = vld [vmem:[%s3251_s1 + $0x58] sm:$0xff] }
 0x12d   :  { %v1774_v43 = vpack.c.bf16 %v428_v40, %v422_v39  ;;  %v348_v45 = vpop.f32.mrb[2].mxu0  ;;  %v580_v46 = vmul.f32 %v2479_v34, %v2481_v41  ;;  %v584_v58 = vmul.f32 %v2496_v55, %v2481_v41  ;;  %v588_v6 = vmul.f32 %v2510_v62, %v2481_v41  ;;  %v62_v39 = vld [vmem:[%s3251_s1 + $0x50] sm:$0xff]  ;;  %v69_v40 = vld [vmem:[%s3251_s1 + $0x88] sm:$0xff] }
 0x12e   :  { %v350_v47 = vpop.f32.mrb[3].mxu0  ;;  %v349_v53 = vadd.f32 %v348_v45, %v249_v44  ;;  %v592_v0 = vmul.f32 %v2524_v11, %v2481_v41  ;;  %v591_v16 = vmul.f32 %v2528_v13, %v343_v49  ;;  %v596_v21 = vmul.f32 %v558_v18, %v2481_v41  ;;  %v68_v44 = vld [vmem:[%s3251_s1 + $0x80] sm:$0xff]  ;;  %v74_v45 = vld [vmem:[%s3251_s1 + $0xb0] sm:$0xff] }
 0x12f   :  { %1775 = vmatprep.subr.bf16.mxu1 %v1774_v43  ;;  %667 = vmatprep.mubr.f32.mxu1 %v580_v46  ;;  %v351_v48 = vadd.f32 %v350_v47, %v253_v31  ;;  %v595_v24 = vmul.f32 %v554_v20, %v343_v49  ;;  %v600_v30 = vmul.f32 %v566_v27, %v2481_v41  ;;  %v75_v41 = vld [vmem:[%s3251_s1 + $0xb8] sm:$0xff]  ;;  %v81_v46 = vld [vmem:[%s3251_s1 + $0xe8] sm:$0xff] }
 0x130   :  { %1777 = vmatpush1.bf16.xpose.msra.mxu1 %v1776_v42  ;;  %v581_v56 = vmul.f32 %v2488_v50, %v349_v53  ;;  %v585_v63 = vmul.f32 %v2500_v57, %v349_v53  ;;  %v589_v12 = vmul.f32 %v2514_v2, %v349_v53  ;;  %v593_v19 = vmul.f32 %v2528_v13, %v349_v53  ;;  %v87_v47 = vld [vmem:[%s3251_s1 + $0x118] sm:$0xff] }
 0x131   :  { %v582_v52 = vmul.f32 %v2479_v34, %v351_v48  ;;  %v586_v61 = vmul.f32 %v2496_v55, %v351_v48  ;;  %v590_v9 = vmul.f32 %v2510_v62, %v351_v48  ;;  %v594_v17 = vmul.f32 %v2524_v11, %v351_v48 }
 0x132   :  { %v598_v26 = vmul.f32 %v558_v18, %v351_v48  ;;  %v597_v28 = vmul.f32 %v554_v20, %v349_v53  ;;  %v599_v31 = vmul.f32 %v562_v29, %v343_v49  ;;  %v602_v32 = vmul.f32 %v566_v27, %v351_v48  ;;  %v122_v18 = vld [vmem:[%s3251_s1 + $0x230] sm:$0xff]  ;;  %v135_v20 = vld [vmem:[%s3251_s1 + $0x298] sm:$0xff]  ;;  %v141_v27 = vld [vmem:[%s3251_s1 + $0x2c8] sm:$0xff] }
 0x133   :  { %v601_v33 = vmul.f32 %v562_v29, %v349_v53  ;;  %v1710_v38 = vpack.c.bf16 %v63_v36, %v57_v35  ;;  %v1712_v42 = vpack.c.bf16 %v62_v39, %v56_v37  ;;  %v1714_v43 = vpack.c.bf16 %v75_v41, %v69_v40  ;;  %v93_v53 = vld [vmem:[%s3251_s1 + $0x148] sm:$0xff]  ;;  %v159_v35 = vld [vmem:[%s3251_s1 + $0x358] sm:$0xff]  ;;  %v158_v39 = vld [vmem:[%s3251_s1 + $0x350] sm:$0xff] }
 0x134   :  { %v1716_v48 = vpack.c.bf16 %v74_v45, %v68_v44  ;;  %v1718_v49 = vpack.c.bf16 %v87_v47, %v81_v46  ;;  %v165_v40 = vld [vmem:[%s3251_s1 + $0x388] sm:$0xff]  ;;  %v171_v41 = vld [vmem:[%s3251_s1 + $0x3b8] sm:$0xff]  ;;  %v164_v44 = vld [vmem:[%s3251_s1 + $0x380] sm:$0xff] }
 0x135   :  { %1711 = vmatprep.subr.bf16.mxu0 %v1710_v38  ;;  %v152_v38 = vld [vmem:[%s3251_s1 + $0x320] sm:$0xff]  ;;  %v170_v45 = vld [vmem:[%s3251_s1 + $0x3b0] sm:$0xff]  ;;  %v177_v46 = vld [vmem:[%s3251_s1 + $0x3e8] sm:$0xff] }
 0x136   :  { %1713 = vmatpush1.bf16.msra.mxu0 %v1712_v42  ;;  %v1744_v42 = vpack.c.bf16 %v158_v39, %v152_v38  ;;  %v183_v47 = vld [vmem:[%s3251_s1 + $0x418] sm:$0xff] }
 0x137   :  { %668 = vmatmul.mubr.f32.vlgmr.msra.gmra.mrb[4].mxu1 %v579_v54  ;;  %1715 = vmatprep.subr.bf16.mxu0 %v1714_v43  ;;  %v99_v54 = vld [vmem:[%s3251_s1 + $0x178] sm:$0xff]  ;;  %v1746_v43 = vpack.c.bf16 %v171_v41, %v165_v40  ;;  %v236_v40 = vld [vmem:[%s3251_s1 + $0x5c0] sm:$0xff]  ;;  %v242_v41 = vld [vmem:[%s3251_s1 + $0x5f0] sm:$0xff] }
 0x138   :  { %672 = vmatprep.mubr.f32.mxu1 %v582_v52  ;;  %v86_v52 = vld [vmem:[%s3251_s1 + $0x110] sm:$0xff] }
 0x13a   :  { %1717 = vmatpush1.bf16.msra.mxu0 %v1716_v48  ;;  %v1748_v48 = vpack.c.bf16 %v170_v45, %v164_v44 }
 0x13b   :  { %673 = vmatmul.mubr.f32.gmra.mrb[6].mxu1 %v581_v56  ;;  %v1720_v56 = vpack.c.bf16 %v86_v52, %v80_v51  ;;  %1719 = vmatprep.subr.bf16.mxu0 %v1718_v49  ;;  %v1750_v49 = vpack.c.bf16 %v183_v47, %v177_v46  ;;  %v176_v51 = vld [vmem:[%s3251_s1 + $0x3e0] sm:$0xff]  ;;  %v182_v52 = vld [vmem:[%s3251_s1 + $0x410] sm:$0xff] }
 0x13c   :  { %677 = vmatprep.mubr.f32.mxu1 %v584_v58  ;;  %v1722_v58 = vpack.c.bf16 %v99_v54, %v93_v53  ;;  %v189_v53 = vld [vmem:[%s3251_s1 + $0x448] sm:$0xff]  ;;  %v195_v54 = vld [vmem:[%s3251_s1 + $0x478] sm:$0xff] }
 0x13e   :  { %1721 = vmatpush1.bf16.msra.mxu0 %v1720_v56  ;;  %v1752_v56 = vpack.c.bf16 %v182_v52, %v176_v51 }
 0x13f   :  { %678 = vmatmul.mubr.f32.gmra.mrb[8].mxu1 %v583_v60  ;;  %v98_v60 = vld [vmem:[%s3251_s1 + $0x170] sm:$0xff]  ;;  %1723 = vmatprep.subr.bf16.mxu0 %v1722_v58  ;;  %v1754_v58 = vpack.c.bf16 %v195_v54, %v189_v53 }
 0x140   :  { %682 = vmatprep.mubr.f32.mxu1 %v586_v61  ;;  %v105_v61 = vld [vmem:[%s3251_s1 + $0x1a8] sm:$0xff] }
 0x143   :  { %683 = vmatmul.mubr.f32.gmra.mrb[10].mxu1 %v585_v63  ;;  %v111_v63 = vld [vmem:[%s3251_s1 + $0x1d8] sm:$0xff] }
 0x144   :  { %687 = vmatprep.mubr.f32.mxu1 %v588_v6  ;;  %v1724_v6 = vpack.c.bf16 %v98_v60, %v92_v59  ;;  %v1726_v7 = vpack.c.bf16 %v111_v63, %v105_v61  ;;  %v188_v59 = vld [vmem:[%s3251_s1 + $0x440] sm:$0xff]  ;;  %v194_v60 = vld [vmem:[%s3251_s1 + $0x470] sm:$0xff]  ;;  %v201_v61 = vld [vmem:[%s3251_s1 + $0x4a8] sm:$0xff] }
 0x145   :  { %v207_v63 = vld [vmem:[%s3251_s1 + $0x4d8] sm:$0xff] }
 0x146   :  { %1725 = vmatpush1.bf16.msra.mxu0 %v1724_v6 }
 0x147   :  { %688 = vmatmul.mubr.f32.gmra.mrb[12].mxu1 %v587_v8  ;;  %v104_v8 = vld [vmem:[%s3251_s1 + $0x1a0] sm:$0xff]  ;;  %1727 = vmatprep.subr.bf16.mxu0 %v1726_v7  ;;  %v1756_v7 = vpack.c.bf16 %v194_v60, %v188_v59 }
 0x148   :  { %692 = vmatprep.mubr.f32.mxu1 %v590_v9  ;;  %v110_v9 = vld [vmem:[%s3251_s1 + $0x1d0] sm:$0xff] }
 0x14b   :  { %693 = vmatmul.mubr.f32.gmra.mrb[14].mxu1 %v589_v12  ;;  %v1728_v12 = vpack.c.bf16 %v110_v9, %v104_v8  ;;  %v1758_v9 = vpack.c.bf16 %v207_v63, %v201_v61  ;;  %v2773_v61 = vld [vmem:[%s3254_s4 + $0x20] sm:$0xff]  ;;  %v2778_v63 = vld [vmem:[%s3254_s4 + $0x30] sm:$0xff] }
 0x14c   :  { %697 = vmatprep.mubr.f32.mxu1 %v592_v0  ;;  %v117_v0 = vld [vmem:[%s3251_s1 + $0x208] sm:$0xff] }
 0x14d   :  { %1729 = vmatpush1.bf16.msra.mxu0 %v1728_v12  ;;  %v200_v12 = vld [vmem:[%s3251_s1 + $0x4a0] sm:$0xff] }
 0x14f   :  { %698 = vmatmul.mubr.f32.gmra.mrb[16].mxu1 %v591_v16  ;;  %v116_v16 = vld [vmem:[%s3251_s1 + $0x200] sm:$0xff] }
 0x150   :  { %702 = vmatprep.mubr.f32.mxu1 %v594_v17  ;;  %v1730_v17 = vpack.c.bf16 %v123_v15, %v117_v0  ;;  %v206_v0 = vld [vmem:[%s3251_s1 + $0x4d0] sm:$0xff]  ;;  %v213_v15 = vld [vmem:[%s3251_s1 + $0x508] sm:$0xff] }
 0x152   :  { %1731 = vmatprep.subr.bf16.mxu0 %v1730_v17 }
 0x153   :  { %703 = vmatmul.mubr.f32.gmra.mrb[18].mxu1 %v593_v19  ;;  %v129_v19 = vld [vmem:[%s3251_s1 + $0x268] sm:$0xff] }
 0x154   :  { %707 = vmatprep.mubr.f32.mxu1 %v596_v21  ;;  %v1732_v21 = vpack.c.bf16 %v122_v18, %v116_v16  ;;  %v1734_v22 = vpack.c.bf16 %v135_v20, %v129_v19  ;;  %v219_v16 = vld [vmem:[%s3251_s1 + $0x538] sm:$0xff]  ;;  %v1760_v18 = vpack.c.bf16 %v206_v0, %v200_v12 }
 0x155   :  { %v1762_v20 = vpack.c.bf16 %v219_v16, %v213_v15 }
 0x156   :  { %1733 = vmatpush1.bf16.msra.mxu0 %v1732_v21  ;;  %v212_v21 = vld [vmem:[%s3251_s1 + $0x500] sm:$0xff] }
 0x157   :  { %708 = vmatmul.mubr.f32.gmra.mrb[20].mxu1 %v595_v24  ;;  %v128_v24 = vld [vmem:[%s3251_s1 + $0x260] sm:$0xff]  ;;  %1735 = vmatprep.subr.bf16.mxu0 %v1734_v22  ;;  %v218_v22 = vld [vmem:[%s3251_s1 + $0x530] sm:$0xff] }
 0x158   :  { %712 = vmatprep.mubr.f32.mxu1 %v598_v26  ;;  %v134_v26 = vld [vmem:[%s3251_s1 + $0x290] sm:$0xff] }
 0x159   :  { %v1736_v29 = vpack.c.bf16 %v134_v26, %v128_v24  ;;  %v225_v24 = vld [vmem:[%s3251_s1 + $0x568] sm:$0xff]  ;;  %v231_v26 = vld [vmem:[%s3251_s1 + $0x598] sm:$0xff] }
 0x15b   :  { %713 = vmatmul.mubr.f32.gmra.mrb[22].mxu1 %v597_v28  ;;  %v147_v28 = vld [vmem:[%s3251_s1 + $0x2f8] sm:$0xff]  ;;  %1737 = vmatpush1.bf16.msra.mxu0 %v1736_v29 }
 0x15c   :  { %717 = vmatprep.mubr.f32.mxu1 %v600_v30  ;;  %v1738_v30 = vpack.c.bf16 %v147_v28, %v141_v27  ;;  %v1764_v28 = vpack.c.bf16 %v218_v22, %v212_v21  ;;  %v2793_v21 = vld [vmem:[%s3254_s4 + $0x18] sm:$0xff] }
 0x15e   :  { %1739 = vmatprep.subr.bf16.mxu0 %v1738_v30  ;;  %v1766_v30 = vpack.c.bf16 %v231_v26, %v225_v24  ;;  %v2798_v26 = vld [vmem:[%s3254_s4 + $0x28] sm:$0xff] }
 0x15f   :  { %718 = vmatmul.mubr.f32.gmra.mrb[24].mxu1 %v599_v31  ;;  %v140_v31 = vld [vmem:[%s3251_s1 + $0x2c0] sm:$0xff] }
 0x160   :  { %722 = vmatprep.mubr.f32.mxu1 %v602_v32  ;;  %v146_v32 = vld [vmem:[%s3251_s1 + $0x2f0] sm:$0xff] }
 0x161   :  { %v1740_v36 = vpack.c.bf16 %v146_v32, %v140_v31  ;;  %v224_v31 = vld [vmem:[%s3251_s1 + $0x560] sm:$0xff]  ;;  %v230_v32 = vld [vmem:[%s3251_s1 + $0x590] sm:$0xff] }
 0x163   :  { %723 = vmatmul.mubr.f32.gmra.mrb[26].mxu1 %v601_v33  ;;  %v153_v33 = vld [vmem:[%s3251_s1 + $0x328] sm:$0xff]  ;;  %1741 = vmatpush1.bf16.msra.mxu0 %v1740_v36 }
 0x164   :  { %v1742_v37 = vpack.c.bf16 %v159_v35, %v153_v33  ;;  %v237_v33 = vld [vmem:[%s3251_s1 + $0x5c8] sm:$0xff]  ;;  %v243_v35 = vld [vmem:[%s3251_s1 + $0x5f8] sm:$0xff]  ;;  %s2758_s1 = sld [smem:[#allocation2 + $0x1]] }
 0x165   :  { %v1770_v39 = vpack.c.bf16 %v243_v35, %v237_v33  ;;  %v2803_v33 = vld [vmem:[%s3254_s4 + $0x38] sm:$0xff] }
 0x166   :  { %1743 = vmatprep.subr.bf16.mxu0 %v1742_v37  ;;  %v1768_v37 = vpack.c.bf16 %v230_v32, %v224_v31 }
 0x167   :  { %1745 = vmatpush1.bf16.msra.mxu0 %v1744_v42 }
 0x168   :  { %1747 = vmatprep.subr.bf16.mxu0 %v1746_v43  ;;  %v1772_v43 = vpack.c.bf16 %v242_v41, %v236_v40 }
 0x16b   :  { %1749 = vmatpush1.bf16.msra.mxu0 %v1748_v48 }
 0x16c   :  { %1751 = vmatprep.subr.bf16.mxu0 %v1750_v49 }
 0x16f   :  { %1753 = vmatpush1.bf16.msra.mxu0 %v1752_v56  ;;  %v731_v56 = vstv %s730_s23 }
 0x170   :  { %1755 = vmatprep.subr.bf16.mxu0 %v1754_v58 }
 0x173   :  { %1757 = vmatpush1.bf16.msra.mxu0 %v1756_v7 }
 0x174   :  { %1759 = vmatprep.subr.bf16.mxu0 %v1758_v9 }
 0x177   :  { %1761 = vmatpush1.bf16.msra.mxu0 %v1760_v18 }
 0x178   :  { %1763 = vmatprep.subr.bf16.mxu0 %v1762_v20  ;;  %v2788_v20 = vld [vmem:[%s3254_s4 + $0x8] sm:$0xff] }
 0x17b   :  { %1765 = vmatpush1.bf16.msra.mxu0 %v1764_v28 }
 0x17c   :  { %1767 = vmatprep.subr.bf16.mxu0 %v1766_v30 }
 0x17f   :  { %1769 = vmatpush1.bf16.msra.mxu0 %v1768_v37 }
 0x180   :  { %1771 = vmatprep.subr.bf16.mxu0 %v1770_v39 }
 0x183   :  { %1773 = vmatpush1.bf16.msra.mxu0 %v1772_v43 }
 0x186   :  { %495 = vmatmul.mubr.f32.vlgmr.msra.gmra.mrb[4].mxu0 %v2428_v1 }
 0x187   :  { %500 = vmatprep.mubr.f32.mxu0 %v2433_v3  ;;  %v2763_v3 = vld [vmem:[%s3254_s4] sm:$0xff] }
 0x18a   :  { %501 = vmatmul.mubr.f32.gmra.mrb[6].mxu0 %v2440_v4  ;;  %v2768_v4 = vld [vmem:[%s3254_s4 + $0x10] sm:$0xff] }
 0x20a   :  { %v2697_v6 = vpop.f32.mrb[4].mxu1 }
 0x20b   :  { %v671_v8 = vpop.f32.mrb[5].mxu1 }
 0x20c   :  { %v737_v8 = vstv %s2758_s1 }
 0x20e   :  { %v2711_v17 = vpop.f32.mrb[6].mxu1 }
 0x20f   :  { %v676_v19 = vpop.f32.mrb[7].mxu1 }
 0x212   :  { %v2725_v27 = vpop.f32.mrb[8].mxu1 }
 0x213   :  { %v681_v29 = vpop.f32.mrb[9].mxu1 }
 0x216   :  { %v2739_v36 = vpop.f32.mrb[10].mxu1 }
 0x217   :  { %v686_v38 = vpop.f32.mrb[11].mxu1 }
 0x21a   :  { %v2747_v42 = vpop.f32.mrb[12].mxu1 }
 0x21b   :  { %v691_v44 = vpop.f32.mrb[13].mxu1 }
 0x21e   :  { %v2749_v45 = vpop.f32.mrb[14].mxu1 }
 0x21f   :  { %v696_v46 = vpop.f32.mrb[15].mxu1 }
 0x222   :  { %v2752_v47 = vpop.f32.mrb[16].mxu1 }
 0x223   :  { %v701_v48 = vpop.f32.mrb[17].mxu1 }
 0x226   :  { %v2756_v49 = vpop.f32.mrb[18].mxu1 }
 0x227   :  { %v706_v51 = vpop.f32.mrb[19].mxu1 }
 0x22a   :  { %v709_v52 = vpop.f32.mrb[20].mxu1 }
 0x22b   :  { %v711_v53 = vpop.f32.mrb[21].mxu1  ;;  %v728_v54 = vmul.f32 0.25, %v709_v52 }
 0x22d   :  { %v732_v59 = vadd.f32 %v731_v56, %v728_v54 }
 0x22e   :  { %v714_v58 = vpop.f32.mrb[22].mxu1 }
 0x22f   :  { %v716_v1 = vpop.f32.mrb[23].mxu1  ;;  %v729_v60 = vmul.f32 0.25, %v714_v58  ;;  %v748_v0 = vmul.f32 %v2763_v3, %v732_v59  ;;  %v750_v16 = vmul.f32 %v2768_v4, %v732_v59  ;;  %v752_v18 = vmul.f32 %v2773_v61, %v732_v59 }
 0x230   :  { %v754_v19 = vmul.f32 %v2778_v63, %v732_v59 }
 0x231   :  { %v733_v15 = vadd.f32 %v731_v56, %v729_v60 }
 0x232   :  { %v719_v7 = vpop.f32.mrb[24].mxu1 }
 0x233   :  { %v734_v9 = vmul.f32 0.25, %v719_v7  ;;  %v721_v12 = vpop.f32.mrb[25].mxu1  ;;  %v749_v35 = vmul.f32 %v2788_v20, %v733_v15  ;;  %v751_v37 = vmul.f32 %v2793_v21, %v733_v15  ;;  %v753_v44 = vmul.f32 %v2798_v26, %v733_v15 }
 0x234   :  { %v755_v52 = vmul.f32 %v2803_v33, %v733_v15 }
 0x235   :  { %v738_v22 = vadd.f32 %v737_v8, %v734_v9 }
 0x236   :  { %v724_v24 = vpop.f32.mrb[26].mxu1 }
 0x237   :  { %v756_v28 = vadd.f32 %v748_v0, %v738_v22  ;;  %v758_v29 = vadd.f32 %v750_v16, %v738_v22  ;;  %v760_v30 = vadd.f32 %v752_v18, %v738_v22  ;;  %v762_v31 = vadd.f32 %v754_v19, %v738_v22  ;;  %v726_v32 = vpop.f32.mrb[27].mxu1 }
 0x238   :  { %v735_v38 = vmul.f32 0.25, %v724_v24 }
 0x239   :  { %v765_v39 = vsel %vm764_vm0, %v756_v28, -inf  ;;  %v766_v40 = vsel %vm764_vm0, %v758_v29, -inf  ;;  %v767_v41 = vsel %vm764_vm0, %v760_v30, -inf  ;;  %v769_v43 = vsel %vm764_vm0, %v762_v31, -inf }
 0x23a   :  { %v768_v46 = vmax.f32 %v765_v39, %v767_v41  ;;  %v770_v48 = vmax.f32 %v766_v40, %v769_v43  ;;  %v739_v51 = vadd.f32 %v737_v8, %v735_v38 }
 0x23c   :  { %v771_v53 = vmax.f32 %v768_v46, %v770_v48  ;;  %v757_v54 = vadd.f32 %v749_v35, %v739_v51  ;;  %v759_v56 = vadd.f32 %v751_v37, %v739_v51  ;;  %v761_v58 = vadd.f32 %v753_v44, %v739_v51 }
 0x23d   :  { %v763_v1 = vadd.f32 %v755_v52, %v739_v51 }
 0x23e   :  { %v779_v59 = vsub.f32 %v756_v28, %v771_v53  ;;  %v781_v60 = vsub.f32 %v758_v29, %v771_v53  ;;  %v783_v7 = vsub.f32 %v760_v30, %v771_v53  ;;  %v785_v9 = vsub.f32 %v762_v31, %v771_v53 }
 0x23f   :  { %v772_v12 = vsel %vm764_vm0, %v757_v54, -inf  ;;  %v773_v0 = vsel %vm764_vm0, %v759_v56, -inf  ;;  %v774_v16 = vsel %vm764_vm0, %v761_v58, -inf  ;;  %v776_v18 = vsel %vm764_vm0, %v763_v1, -inf }
 0x240   :  { %v787_v8 = vmul.f32 1.442695, %v779_v59  ;;  %v791_v19 = vmul.f32 1.442695, %v781_v60  ;;  %v795_v15 = vmul.f32 1.442695, %v783_v7  ;;  %v775_v22 = vmax.f32 %v772_v12, %v774_v16 }
 0x241   :  { %v799_v24 = vmul.f32 1.442695, %v785_v9  ;;  %v777_v32 = vmax.f32 %v773_v0, %v776_v18 }
 0x242   :  { %1879 = vpow2.f32 %v787_v8 }
 0x243   :  { %1881 = vpow2.f32 %v791_v19  ;;  %v778_v28 = vmax.f32 %v775_v22, %v777_v32 }
 0x244   :  { %1883 = vpow2.f32 %v795_v15 }
 0x245   :  { %1885 = vpow2.f32 %v799_v24  ;;  %v780_v29 = vsub.f32 %v757_v54, %v778_v28  ;;  %v782_v30 = vsub.f32 %v759_v56, %v778_v28  ;;  %v784_v31 = vsub.f32 %v761_v58, %v778_v28 }
 0x246   :  { %v786_v35 = vsub.f32 %v763_v1, %v778_v28 }
 0x247   :  { %v789_v37 = vmul.f32 1.442695, %v780_v29  ;;  %v793_v38 = vmul.f32 1.442695, %v782_v30  ;;  %v797_v39 = vmul.f32 1.442695, %v784_v31 }
 0x248   :  { %v801_v40 = vmul.f32 1.442695, %v786_v35  ;;  %v901_v35 = vpop.permute.xlu1 %900 }
 0x249   :  { %1887 = vpow2.f32 %v789_v37 }
 0x24a   :  { %1889 = vpow2.f32 %v793_v38 }
 0x24b   :  { %1891 = vpow2.f32 %v797_v39  ;;  %v897_v39 = vpop.permute.xlu0 %896 }
 0x24c   :  { %v1880_v41 = vpop.eup %1879  ;;  %1893 = vpow2.f32 %v801_v40 }
 0x24d   :  { %v1882_v43 = vpop.eup %1881  ;;  %v803_v44 = vsel %vm764_vm0, %v1880_v41, 0.0 }
 0x24e   :  { %v1884_v46 = vpop.eup %1883  ;;  %v804_v48 = vsel %vm764_vm0, %v1882_v43, 0.0 }
 0x24f   :  { %v1886_v51 = vpop.eup %1885  ;;  %v805_v52 = vadd.f32 %v804_v48, %v803_v44  ;;  %v806_v53 = vsel %vm764_vm0, %v1884_v46, 0.0 }
 0x250   :  { %v808_v56 = vsel %vm764_vm0, %v1886_v51, 0.0 }
 0x251   :  { %v807_v54 = vadd.f32 %v806_v53, %v805_v52 }
 0x253   :  { %v1888_v58 = vpop.eup %1887  ;;  %v809_v1 = vadd.f32 %v808_v56, %v807_v54 }
 0x254   :  { %v1890_v59 = vpop.eup %1889  ;;  %v810_v60 = vsel %vm764_vm0, %v1888_v58, 0.0 }
 0x255   :  { %v1892_v7 = vpop.eup %1891  ;;  %1895 = vrcp.f32 %v809_v1  ;;  %v811_v9 = vsel %vm764_vm0, %v1890_v59, 0.0 }
 0x256   :  { %v1894_v12 = vpop.eup %1893  ;;  %v812_v0 = vadd.f32 %v811_v9, %v810_v60  ;;  %v813_v16 = vsel %vm764_vm0, %v1892_v7, 0.0  ;;  %v893_v60 = vpop.permute.xlu0 %892 }
 0x257   :  { %v815_v8 = vsel %vm764_vm0, %v1894_v12, 0.0 }
 0x258   :  { %v814_v18 = vadd.f32 %v813_v16, %v812_v0 }
 0x25a   :  { %v816_v19 = vadd.f32 %v815_v8, %v814_v18 }
 0x25c   :  { %1897 = vrcp.f32 %v816_v19 }
 0x25f   :  { %v1896_v15 = vpop.eup %1895 }
 0x260   :  { %v818_v22 = vmul.f32 %v1896_v15, %v1880_v41  ;;  %v821_v24 = vmul.f32 %v1896_v15, %v1882_v43  ;;  %v823_v32 = vmul.f32 %v1896_v15, %v1884_v46  ;;  %v825_v28 = vmul.f32 %v1896_v15, %v1886_v51 }
 0x261   :  { %v925_v15 = vadd.s32 8, %v2451_v10 }
 0x262   :  { %v827_v29 = vmul.f32 %v818_v22, %v2763_v3  ;;  %v829_v30 = vmul.f32 %v821_v24, %v2768_v4  ;;  %v831_v31 = vmul.f32 %v823_v32, %v2773_v61  ;;  %v833_v40 = vmul.f32 %v825_v28, %v2778_v63  ;;  %v905_v63 = vpop.permute.xlu1 %904 }
 0x263   :  { %v927_v4 = vand.u32 127, %v246_v5 }
 0x264   :  { %v835_v37 = vsel %vm764_vm0, %v827_v29, 0.0  ;;  %v836_v38 = vsel %vm764_vm0, %v829_v30, 0.0  ;;  %v838_v41 = vsel %vm764_vm0, %v831_v31, 0.0  ;;  %v840_v56 = vsel %vm764_vm0, %v833_v40, 0.0 }
 0x265   :  { %v837_v44 = vadd.f32 %v836_v38, %v835_v37  ;;  %vm928_vm1 = vcmp.eq.s32.totalorder %v2451_v10, %v927_v4  ;;  %vm929_vm2 = vcmp.eq.s32.totalorder %v925_v15, %v927_v4 }
 0x266   :  { %v1898_v48 = vpop.eup %1897 }
 0x267   :  { %v820_v43 = vmul.f32 %v1898_v48, %v1888_v58  ;;  %v822_v46 = vmul.f32 %v1898_v48, %v1890_v59  ;;  %v824_v51 = vmul.f32 %v1898_v48, %v1892_v7  ;;  %v826_v3 = vmul.f32 %v1898_v48, %v1894_v12 }
 0x268   :  { %v839_v52 = vadd.f32 %v838_v41, %v837_v44 }
 0x269   :  { %v828_v61 = vmul.f32 %v820_v43, %v2788_v20  ;;  %v830_v53 = vmul.f32 %v822_v46, %v2793_v21  ;;  %v832_v54 = vmul.f32 %v824_v51, %v2798_v26  ;;  %v834_v9 = vmul.f32 %v826_v3, %v2803_v33 }
 0x26a   :  { %v841_v1 = vadd.f32 %v840_v56, %v839_v52  ;;  %v264_v51 = vsub.s32 4, %v2451_v10  ;;  %v268_v3 = vsub.s32 5, %v2451_v10 }
 0x26b   :  { %v842_v58 = vsel %vm764_vm0, %v828_v61, 0.0  ;;  %v843_v59 = vsel %vm764_vm0, %v830_v53, 0.0  ;;  %v845_v20 = vsel %vm764_vm0, %v832_v54, 0.0  ;;  %v847_v8 = vsel %vm764_vm0, %v834_v9, 0.0  ;;  %v496_v53 = vpop.f32.mrb[4].mxu0 }
 0x26c   :  { %v844_v7 = vadd.f32 %v843_v59, %v842_v58  ;;  %v911_v12 = vmul.f32 %v901_v35, %v841_v1  ;;  %v909_v5 = vmul.f32 %v897_v39, %v841_v1  ;;  %v913_v0 = vmul.f32 %v905_v63, %v841_v1  ;;  %v498_v4 = vpop.f32.mrb[5].mxu0 }
 0x26d   :  { %v907_v21 = vmul.f32 %v893_v60, %v841_v1  ;;  %v265_v52 = vrot.slane %v2465_v23, %v264_v51  ;;  %v269_v61 = vrot.slane %v2465_v23, %v268_v3 }
 0x26e   :  { %v846_v26 = vadd.f32 %v845_v20, %v844_v7  ;;  %v917_v16 = vadd.f32 %v909_v5, %v2725_v27  ;;  %v919_v18 = vadd.f32 %v911_v12, %v2747_v42  ;;  %v921_v33 = vadd.f32 %v913_v0, %v2752_v47 }
 0x26f   :  { %v915_v19 = vadd.f32 %v907_v21, %v2697_v6  ;;  %v2879_v54 = vadd.f32 %v496_v53, %v265_v52  ;;  %v2881_v56 = vadd.f32 %v498_v4, %v269_v61 }
 0x270   :  { %v848_v22 = vadd.f32 %v847_v8, %v846_v26  ;;  %v936_v24 = vsel %vm928_vm1, -1e+09, %v917_v16  ;;  %v938_v44 = vsel %vm928_vm1, -1e+09, %v919_v18 }
 0x271   :  { %v948_v32 = vsel %vm764_vm0, %v936_v24, -inf  ;;  %v934_v28 = vsel %vm928_vm1, -1e+09, %v915_v19  ;;  %v1042_v1 = vmul.f32 %v2500_v57, %v2879_v54  ;;  %v1043_v10 = vmul.f32 %v2496_v55, %v2881_v56 }
 0x272   :  { %v912_v27 = vmul.f32 %v901_v35, %v848_v22  ;;  %v910_v29 = vmul.f32 %v897_v39, %v848_v22  ;;  %v914_v42 = vmul.f32 %v905_v63, %v848_v22  ;;  %v908_v30 = vmul.f32 %v893_v60, %v848_v22  ;;  %949 = vmax.xlane.f32.xlu0 %v948_v32  ;;  %v502_v63 = vpop.f32.mrb[6].mxu0 }
 0x273   :  { %v942_v38 = vsel %vm764_vm0, %v934_v28, -inf  ;;  %v2885_v60 = vadd.f32 %v502_v63, %v265_v52  ;;  %v504_v9 = vpop.f32.mrb[7].mxu0  ;;  %v1039_v23 = vmul.f32 %v2479_v34, %v2881_v56  ;;  %v2934_v53 = vmul.f32 %v2488_v50, %v2879_v54 }
 0x274   :  { %v918_v47 = vadd.f32 %v910_v29, %v2739_v36  ;;  %v916_v6 = vadd.f32 %v908_v30, %v2711_v17  ;;  %v920_v31 = vadd.f32 %v912_v27, %v2749_v45  ;;  %v922_v37 = vadd.f32 %v914_v42, %v2756_v49 }
 0x275   :  { %v954_v45 = vsel %vm764_vm0, %v938_v44, -inf  ;;  %v940_v49 = vsel %vm928_vm1, -1e+09, %v921_v33  ;;  %v2887_v58 = vadd.f32 %v504_v9, %v269_v61  ;;  %v1044_v59 = vmul.f32 %v2500_v57, %v2885_v60 }
 0x276   :  { %943 = vmax.xlane.f32.xlu0 %v942_v38  ;;  %v937_v40 = vsel %vm929_vm2, -1e+09, %v918_v47  ;;  %v935_v35 = vsel %vm929_vm2, -1e+09, %v916_v6  ;;  %v939_v17 = vsel %vm929_vm2, -1e+09, %v920_v31  ;;  %v2938_v4 = vmul.f32 %v2514_v2, %v2879_v54 }
 0x277   :  { %v951_v39 = vsel %vm764_vm0, %v937_v40, -inf  ;;  %v945_v36 = vsel %vm764_vm0, %v935_v35, -inf  ;;  %v957_v48 = vsel %vm764_vm0, %v939_v17, -inf  ;;  %v2870_v41 = vsel %vm929_vm2, -1e+09, %v922_v37 }
 0x278   :  { %952 = vmax.xlane.f32.xlu1 %v951_v39  ;;  %v960_v43 = vsel %vm764_vm0, %v940_v49, -inf  ;;  %v963_v46 = vsel %vm764_vm0, %v2870_v41, -inf  ;;  %v1045_v7 = vmul.f32 %v2496_v55, %v2887_v58  ;;  %v1041_v12 = vmul.f32 %v2479_v34, %v2887_v58 }
 0x279   :  { %v1780_v5 = vpack.c.bf16 %v1044_v59, %v1042_v1  ;;  %v2942_v63 = vmul.f32 %v2488_v50, %v2885_v60  ;;  %v2946_v1 = vmul.f32 %v2514_v2, %v2885_v60  ;;  %v2950_v9 = vmul.f32 %v2528_v13, %v2879_v54 }
 0x27a   :  { %946 = vmax.xlane.f32.xlu0 %v945_v36  ;;  %v1778_v0 = vpack.c.bf16 %v1045_v7, %v1043_v10  ;;  %v1782_v20 = vpack.c.bf16 %v1041_v12, %v1039_v23  ;;  %v2954_v10 = vmul.f32 %v2528_v13, %v2885_v60  ;;  %v2958_v23 = vmul.f32 %v2510_v62, %v2881_v56  ;;  %v1394_v12 = vld [vmem:[%s3256_s6] sm:$0xff] }
 0x27b   :  { %v2962_v50 = vmul.f32 %v2510_v62, %v2887_v58  ;;  %v2966_v2 = vmul.f32 %v2524_v11, %v2881_v56  ;;  %v2970_v54 = vmul.f32 %v2524_v11, %v2887_v58  ;;  %v1784_v13 = vpack.c.bf16 %v2942_v63, %v2934_v53  ;;  %v1395_v11 = vld [vmem:[%s3256_s6 + $0x8] sm:$0xff]  ;;  %v1397_v58 = vld [vmem:[%s3256_s6 + $0x18] sm:$0xff] }
 0x27c   :  { %955 = vmax.xlane.f32.xlu1 %v954_v45  ;;  %1779 = vmatprep.subr.bf16.mxu1 %v1778_v0  ;;  %v1788_v59 = vpack.c.bf16 %v2946_v1, %v2938_v4  ;;  %v1792_v56 = vpack.c.bf16 %v2954_v10, %v2950_v9  ;;  %v1972_v7 = vmov 0.0   ;;  %v1396_v0 = vld [vmem:[%s3256_s6 + $0x10] sm:$0xff] }
 0x27d   :  { %1781 = vmatpush1.bf16.msra.mxu1 %v1780_v5  ;;  %v1786_v60 = vpack.c.bf16 %v2962_v50, %v2958_v23  ;;  %v1790_v62 = vpack.c.bf16 %v2970_v54, %v2966_v2  ;;  %1124 = vmatprep.mubr.f32.mxu1 %v1972_v7  ;;  %v1794_v5 = vpack.c.bf16 %v1397_v58, %v1395_v11  ;;  %v1418_v58 = vld [vmem:[%s3256_s6 + $0xc0] sm:$0xff] }
 0x27e   :  { %958 = vmax.xlane.f32.xlu0 %v957_v48  ;;  %1783 = vmatprep.subr.bf16.mxu1 %v1782_v20  ;;  %v1399_v20 = vld [vmem:[%s3256_s6 + $0x28] sm:$0xff] }
 0x27f   :  { %1795 = vmatprep.subr.bf16.mxu0 %v1794_v5  ;;  %v1423_v5 = vld [vmem:[%s3256_s6 + $0xe8] sm:$0xff] }
 0x280   :  { %961 = vmax.xlane.f32.xlu1 %v960_v43 }
 0x282   :  { %964 = vmax.xlane.f32.xlu0 %v963_v46 }
 0x2ff   :  { %v950_v21 = vpop.xlane.xlu0 %949 }
 0x300   :  { %v968_v26 = vsub.f32 %v936_v24, %v950_v21  ;;  %v1401_v21 = vld [vmem:[%s3256_s6 + $0x38] sm:$0xff] }
 0x302   :  { %v978_v16 = vmul.f32 1.442695, %v968_v26  ;;  %v1796_v26 = vpack.c.bf16 %v1396_v0, %v1394_v12  ;;  %v1420_v12 = vld [vmem:[%s3256_s6 + $0xd0] sm:$0xff]  ;;  %v1425_v0 = vld [vmem:[%s3256_s6 + $0xf8] sm:$0xff] }
 0x303   :  { %v944_v18 = vpop.xlane.xlu0 %943 }
 0x304   :  { %1899 = vpow2.f32 %v978_v16  ;;  %v966_v33 = vsub.f32 %v934_v28, %v944_v18  ;;  %v1798_v16 = vpack.c.bf16 %v1401_v21, %v1399_v20  ;;  %v1398_v18 = vld [vmem:[%s3256_s6 + $0x20] sm:$0xff]  ;;  %1797 = vmatpush1.bf16.msra.mxu0 %v1796_v26  ;;  %v1820_v20 = vpack.c.bf16 %v1420_v12, %v1418_v58  ;;  %v1447_v58 = vld [vmem:[%s3256_s6 + $0x1a8] sm:$0xff]  ;;  %v1449_v12 = vld [vmem:[%s3256_s6 + $0x1b8] sm:$0xff] }
 0x305   :  { %v953_v8 = vpop.xlane.xlu1 %952  ;;  %v1822_v21 = vpack.c.bf16 %v1425_v0, %v1423_v5  ;;  %v1422_v26 = vld [vmem:[%s3256_s6 + $0xe0] sm:$0xff]  ;;  %v1846_v0 = vpack.c.bf16 %v1449_v12, %v1447_v58 }
 0x306   :  { %v974_v57 = vmul.f32 1.442695, %v966_v33  ;;  %v969_v19 = vsub.f32 %v937_v40, %v953_v8  ;;  %v1400_v33 = vld [vmem:[%s3256_s6 + $0x30] sm:$0xff]  ;;  %v1403_v8 = vld [vmem:[%s3256_s6 + $0x48] sm:$0xff]  ;;  %1799 = vmatprep.subr.bf16.mxu0 %v1798_v16 }
 0x307   :  { %v947_v15 = vpop.xlane.xlu0 %946  ;;  %v1424_v16 = vld [vmem:[%s3256_s6 + $0xf0] sm:$0xff] }
 0x308   :  { %1901 = vpow2.f32 %v974_v57  ;;  %v980_v55 = vmul.f32 1.442695, %v969_v19  ;;  %v967_v22 = vsub.f32 %v935_v35, %v947_v15  ;;  %v1405_v57 = vld [vmem:[%s3256_s6 + $0x58] sm:$0xff]  ;;  %v1800_v19 = vpack.c.bf16 %v1400_v33, %v1398_v18  ;;  %v1427_v18 = vld [vmem:[%s3256_s6 + $0x108] sm:$0xff] }
 0x309   :  { %v956_v34 = vpop.xlane.xlu1 %955  ;;  %v1802_v15 = vpack.c.bf16 %v1405_v57, %v1403_v8  ;;  %v1429_v33 = vld [vmem:[%s3256_s6 + $0x118] sm:$0xff]  ;;  %v1824_v8 = vpack.c.bf16 %v1424_v16, %v1422_v26  ;;  %v1451_v26 = vld [vmem:[%s3256_s6 + $0x1c8] sm:$0xff] }
 0x30a   :  { %1903 = vpow2.f32 %v980_v55  ;;  %v970_v32 = vsub.f32 %v938_v44, %v956_v34  ;;  %v976_v27 = vmul.f32 1.442695, %v967_v22  ;;  %v1402_v55 = vld [vmem:[%s3256_s6 + $0x40] sm:$0xff]  ;;  %v1404_v22 = vld [vmem:[%s3256_s6 + $0x50] sm:$0xff]  ;;  %v1407_v34 = vld [vmem:[%s3256_s6 + $0x68] sm:$0xff]  ;;  %1801 = vmatpush1.bf16.msra.mxu0 %v1800_v19  ;;  %v1826_v57 = vpack.c.bf16 %v1429_v33, %v1427_v18 }
 0x30b   :  { %v959_v29 = vpop.xlane.xlu0 %958  ;;  %1803 = vmatprep.subr.bf16.mxu0 %v1802_v15  ;;  %v1426_v19 = vld [vmem:[%s3256_s6 + $0x100] sm:$0xff]  ;;  %v1428_v15 = vld [vmem:[%s3256_s6 + $0x110] sm:$0xff]  ;;  %v1453_v16 = vld [vmem:[%s3256_s6 + $0x1d8] sm:$0xff] }
 0x30c   :  { %v982_v24 = vmul.f32 1.442695, %v970_v32  ;;  %1905 = vpow2.f32 %v976_v27  ;;  %v971_v42 = vsub.f32 %v939_v17, %v959_v29  ;;  %v1409_v32 = vld [vmem:[%s3256_s6 + $0x78] sm:$0xff]  ;;  %v1804_v27 = vpack.c.bf16 %v1404_v22, %v1402_v55  ;;  %v1431_v55 = vld [vmem:[%s3256_s6 + $0x128] sm:$0xff] }
 0x30d   :  { %v962_v30 = vpop.xlane.xlu1 %961  ;;  %v1806_v29 = vpack.c.bf16 %v1409_v32, %v1407_v34  ;;  %v1433_v22 = vld [vmem:[%s3256_s6 + $0x138] sm:$0xff]  ;;  %v1828_v34 = vpack.c.bf16 %v1428_v15, %v1426_v19  ;;  %v1850_v33 = vpack.c.bf16 %v1453_v16, %v1451_v26  ;;  %v1455_v19 = vld [vmem:[%s3256_s6 + $0x1e8] sm:$0xff] }
 0x30e   :  { %v2899_v47 = vpop.eup %1899  ;;  %1907 = vpow2.f32 %v982_v24  ;;  %v972_v28 = vsub.f32 %v940_v49, %v962_v30  ;;  %v984_v6 = vmul.f32 1.442695, %v971_v42  ;;  %v1406_v24 = vld [vmem:[%s3256_s6 + $0x60] sm:$0xff]  ;;  %v1408_v42 = vld [vmem:[%s3256_s6 + $0x70] sm:$0xff]  ;;  %v1411_v30 = vld [vmem:[%s3256_s6 + $0x88] sm:$0xff]  ;;  %1805 = vmatpush1.bf16.msra.mxu0 %v1804_v27  ;;  %v1830_v32 = vpack.c.bf16 %v1433_v22, %v1431_v55 }
 0x30f   :  { %v965_v31 = vpop.xlane.xlu0 %964  ;;  %v996_v37 = vsel %vm764_vm0, %v2899_v47, 0.0  ;;  %1807 = vmatprep.subr.bf16.mxu0 %v1806_v29  ;;  %v1430_v27 = vld [vmem:[%s3256_s6 + $0x120] sm:$0xff]  ;;  %v1432_v29 = vld [vmem:[%s3256_s6 + $0x130] sm:$0xff]  ;;  %v1457_v15 = vld [vmem:[%s3256_s6 + $0x1f8] sm:$0xff] }
 0x310   :  { %v986_v38 = vmul.f32 1.442695, %v972_v28  ;;  %1909 = vpow2.f32 %v984_v6  ;;  %v973_v40 = vsub.f32 %v2870_v41, %v965_v31  ;;  %997 = vadd.xlane.f32.xlu1 %v996_v37  ;;  %v1413_v28 = vld [vmem:[%s3256_s6 + $0x98] sm:$0xff]  ;;  %v1808_v6 = vpack.c.bf16 %v1408_v42, %v1406_v24  ;;  %v1410_v37 = vld [vmem:[%s3256_s6 + $0x80] sm:$0xff]  ;;  %v1435_v24 = vld [vmem:[%s3256_s6 + $0x148] sm:$0xff] }
 0x311   :  { %v1810_v31 = vpack.c.bf16 %v1413_v28, %v1411_v30  ;;  %v1437_v42 = vld [vmem:[%s3256_s6 + $0x158] sm:$0xff]  ;;  %v1832_v30 = vpack.c.bf16 %v1432_v29, %v1430_v27  ;;  %v1854_v22 = vpack.c.bf16 %v1457_v15, %v1455_v19 }
 0x312   :  { %v2904_v35 = vpop.eup %1901  ;;  %1911 = vpow2.f32 %v986_v38  ;;  %v988_v39 = vmul.f32 1.442695, %v973_v40  ;;  %v1412_v38 = vld [vmem:[%s3256_s6 + $0x90] sm:$0xff]  ;;  %v1415_v40 = vld [vmem:[%s3256_s6 + $0xa8] sm:$0xff]  ;;  %1809 = vmatpush1.bf16.msra.mxu0 %v1808_v6  ;;  %v1834_v28 = vpack.c.bf16 %v1437_v42, %v1435_v24  ;;  %v1434_v6 = vld [vmem:[%s3256_s6 + $0x140] sm:$0xff] }
 0x313   :  { %v990_v44 = vsel %vm764_vm0, %v2904_v35, 0.0  ;;  %1811 = vmatprep.subr.bf16.mxu0 %v1810_v31  ;;  %v1436_v31 = vld [vmem:[%s3256_s6 + $0x150] sm:$0xff] }
 0x314   :  { %v2908_v36 = vpop.eup %1903  ;;  %1913 = vpow2.f32 %v988_v39  ;;  %991 = vadd.xlane.f32.xlu1 %v990_v44  ;;  %v1417_v39 = vld [vmem:[%s3256_s6 + $0xb8] sm:$0xff]  ;;  %v1812_v44 = vpack.c.bf16 %v1412_v38, %v1410_v37  ;;  %v1439_v37 = vld [vmem:[%s3256_s6 + $0x168] sm:$0xff] }
 0x315   :  { %v999_v17 = vsel %vm764_vm0, %v2908_v36, 0.0  ;;  %v1441_v38 = vld [vmem:[%s3256_s6 + $0x178] sm:$0xff] }
 0x316   :  { %v2912_v45 = vpop.eup %1905  ;;  %1000 = vadd.xlane.f32.xlu0 %v999_v17  ;;  %v1814_v17 = vpack.c.bf16 %v1417_v39, %v1415_v40  ;;  %1813 = vmatpush1.bf16.msra.mxu0 %v1812_v44  ;;  %v1836_v40 = vpack.c.bf16 %v1436_v31, %v1434_v6  ;;  %v1838_v39 = vpack.c.bf16 %v1441_v38, %v1439_v37  ;;  %v1438_v44 = vld [vmem:[%s3256_s6 + $0x160] sm:$0xff] }
 0x317   :  { %v993_v49 = vsel %vm764_vm0, %v2912_v45, 0.0 }
 0x318   :  { %v2916_v48 = vpop.eup %1907  ;;  %1815 = vmatprep.subr.bf16.mxu0 %v1814_v17  ;;  %v1440_v17 = vld [vmem:[%s3256_s6 + $0x170] sm:$0xff] }
 0x319   :  { %v1002_v41 = vsel %vm764_vm0, %v2916_v48, 0.0 }
 0x31a   :  { %v2920_v43 = vpop.eup %1909  ;;  %1003 = vadd.xlane.f32.xlu1 %v1002_v41  ;;  %994 = vadd.xlane.f32.xlu0 %v993_v49  ;;  %v1414_v49 = vld [vmem:[%s3256_s6 + $0xa0] sm:$0xff]  ;;  %v1416_v41 = vld [vmem:[%s3256_s6 + $0xb0] sm:$0xff] }
 0x31b   :  { %v1005_v46 = vsel %vm764_vm0, %v2920_v43, 0.0 }
 0x31c   :  { %v2924_v51 = vpop.eup %1911 }
 0x31d   :  { %v1008_v3 = vsel %vm764_vm0, %v2924_v51, 0.0 }
 0x31e   :  { %v2928_v52 = vpop.eup %1913  ;;  %1009 = vadd.xlane.f32.xlu1 %v1008_v3  ;;  %1006 = vadd.xlane.f32.xlu0 %v1005_v46  ;;  %v1419_v46 = vld [vmem:[%s3256_s6 + $0xc8] sm:$0xff]  ;;  %v1421_v3 = vld [vmem:[%s3256_s6 + $0xd8] sm:$0xff] }
 0x31f   :  { %v1011_v61 = vsel %vm764_vm0, %v2928_v52, 0.0  ;;  %v1818_v11 = vpack.c.bf16 %v1421_v3, %v1419_v46  ;;  %v1840_v46 = vpack.c.bf16 %v1440_v17, %v1438_v44 }
 0x322   :  { %1012 = vadd.xlane.f32.xlu0 %v1011_v61  ;;  %v1816_v61 = vpack.c.bf16 %v1416_v41, %v1414_v49  ;;  %v1443_v49 = vld [vmem:[%s3256_s6 + $0x188] sm:$0xff]  ;;  %v1445_v41 = vld [vmem:[%s3256_s6 + $0x198] sm:$0xff] }
 0x323   :  { %v1842_v3 = vpack.c.bf16 %v1445_v41, %v1443_v49 }
 0x324   :  { %1817 = vmatpush1.bf16.msra.mxu0 %v1816_v61  ;;  %v1442_v61 = vld [vmem:[%s3256_s6 + $0x180] sm:$0xff] }
 0x325   :  { %1819 = vmatprep.subr.bf16.mxu0 %v1818_v11  ;;  %v1444_v11 = vld [vmem:[%s3256_s6 + $0x190] sm:$0xff] }
 0x326   :  { %v1844_v5 = vpack.c.bf16 %v1444_v11, %v1442_v61 }
 0x328   :  { %1821 = vmatpush1.bf16.msra.mxu0 %v1820_v20  ;;  %v1446_v20 = vld [vmem:[%s3256_s6 + $0x1a0] sm:$0xff] }
 0x329   :  { %1823 = vmatprep.subr.bf16.mxu0 %v1822_v21  ;;  %v1448_v21 = vld [vmem:[%s3256_s6 + $0x1b0] sm:$0xff] }
 0x32a   :  { %v1848_v18 = vpack.c.bf16 %v1448_v21, %v1446_v20 }
 0x32c   :  { %1825 = vmatpush1.bf16.msra.mxu0 %v1824_v8  ;;  %v1450_v8 = vld [vmem:[%s3256_s6 + $0x1c0] sm:$0xff] }
 0x32d   :  { %1827 = vmatprep.subr.bf16.mxu0 %v1826_v57  ;;  %v1452_v57 = vld [vmem:[%s3256_s6 + $0x1d0] sm:$0xff] }
 0x32e   :  { %v1852_v55 = vpack.c.bf16 %v1452_v57, %v1450_v8 }
 0x330   :  { %1829 = vmatpush1.bf16.msra.mxu0 %v1828_v34 }
 0x331   :  { %1831 = vmatprep.subr.bf16.mxu0 %v1830_v32 }
 0x334   :  { %1833 = vmatpush1.bf16.msra.mxu0 %v1832_v30 }
 0x335   :  { %1835 = vmatprep.subr.bf16.mxu0 %v1834_v28 }
 0x338   :  { %1837 = vmatpush1.bf16.msra.mxu0 %v1836_v40 }
 0x339   :  { %1839 = vmatprep.subr.bf16.mxu0 %v1838_v39 }
 0x33c   :  { %1841 = vmatpush1.bf16.msra.mxu0 %v1840_v46 }
 0x33d   :  { %1843 = vmatprep.subr.bf16.mxu0 %v1842_v3 }
 0x340   :  { %1845 = vmatpush1.bf16.msra.mxu0 %v1844_v5 }
 0x341   :  { %1847 = vmatprep.subr.bf16.mxu0 %v1846_v0 }
 0x344   :  { %1849 = vmatpush1.bf16.msra.mxu0 %v1848_v18 }
 0x345   :  { %1851 = vmatprep.subr.bf16.mxu0 %v1850_v33 }
 0x348   :  { %1853 = vmatpush1.bf16.msra.mxu0 %v1852_v55 }
 0x349   :  { %1855 = vmatprep.subr.bf16.mxu0 %v1854_v22 }
 0x39d   :  { %v998_v34 = vpop.xlane.xlu1 %997 }
 0x39e   :  { %1915 = vrcp.f32 %v998_v34 }
 0x3a1   :  { %v992_v32 = vpop.xlane.xlu1 %991 }
 0x3a2   :  { %1917 = vrcp.f32 %v992_v32 }
 0x3a3   :  { %v1001_v27 = vpop.xlane.xlu0 %1000 }
 0x3a4   :  { %1919 = vrcp.f32 %v1001_v27 }
 0x3a7   :  { %v1004_v29 = vpop.xlane.xlu1 %1003  ;;  %v995_v24 = vpop.xlane.xlu0 %994 }
 0x3a8   :  { %v1916_v42 = vpop.eup %1915  ;;  %1921 = vrcp.f32 %v1004_v29 }
 0x3a9   :  { %v1019_v30 = vmul.f32 %v1916_v42, %v2899_v47  ;;  %1923 = vrcp.f32 %v995_v24 }
 0x3ab   :  { %1032 = vst.msk [vmem:[#allocation5 + $0x10] sm:$0xff] %vm764_vm0, %v1019_v30  ;;  %v1010_v28 = vpop.xlane.xlu1 %1009  ;;  %v1007_v6 = vpop.xlane.xlu0 %1006  ;;  %1574 = vmatmul.mubr.msk.f32.vlgmr.msra.gmra.mrb[28].mxu1 %vm764_vm0, %v1019_v30 }
 0x3ac   :  { %v1918_v31 = vpop.eup %1917  ;;  %1925 = vrcp.f32 %v1010_v28  ;;  %1785 = vmatpush1.bf16.msra.mxu1 %v1784_v13  ;;  %1130 = vmatprep.mubr.f32.mxu1 %v1972_v7 }
 0x3ad   :  { %v1015_v37 = vmul.f32 %v1918_v31, %v2904_v35  ;;  %1927 = vrcp.f32 %v1007_v6  ;;  %1787 = vmatprep.subr.bf16.mxu1 %v1786_v60 }
 0x3ae   :  { %v1920_v47 = vpop.eup %1919 }
 0x3af   :  { %1030 = vst.msk [vmem:[#allocation5] sm:$0xff] %vm764_vm0, %v1015_v37  ;;  %v1013_v38 = vpop.xlane.xlu0 %1012  ;;  %v1021_v40 = vmul.f32 %v1920_v47, %v2908_v36 }
 0x3b0   :  { %1929 = vrcp.f32 %v1013_v38 }
 0x3b1   :  { %1033 = vst.msk [vmem:[#allocation5 + $0x18] sm:$0xff] %vm764_vm0, %v1021_v40  ;;  %1575 = vmatmul.mubr.msk.f32.gmra.mrb[30].mxu1 %vm764_vm0, %v1021_v40 }
 0x3b2   :  { %v1922_v53 = vpop.eup %1921  ;;  %1207 = vmatprep.mubr.f32.mxu1 %v1972_v7 }
 0x3b3   :  { %v1924_v35 = vpop.eup %1923  ;;  %v1023_v63 = vmul.f32 %v1922_v53, %v2916_v48 }
 0x3b4   :  { %v1017_v23 = vmul.f32 %v1924_v35, %v2912_v45 }
 0x3b5   :  { %1034 = vst.msk [vmem:[#allocation5 + $0x20] sm:$0xff] %vm764_vm0, %v1023_v63  ;;  %1576 = vmatmul.mubr.msk.f32.vlgmr.msra.gmra.mrb[28].mxu1 %vm764_vm0, %v1015_v37 }
 0x3b6   :  { %v1926_v50 = vpop.eup %1925  ;;  %1789 = vmatpush1.bf16.msra.mxu1 %v1788_v59  ;;  %1213 = vmatprep.mubr.f32.mxu1 %v1972_v7  ;;  %1031 = vst.msk [vmem:[#allocation5 + $0x8] sm:$0xff] %vm764_vm0, %v1017_v23 }
 0x3b7   :  { %v1928_v36 = vpop.eup %1927  ;;  %v1027_v13 = vmul.f32 %v1926_v50, %v2924_v51  ;;  %1791 = vmatprep.subr.bf16.mxu1 %v1790_v62  ;;  %v1456_v51 = vld [vmem:[%s3256_s6 + $0x1f0] sm:$0xff] }
 0x3b8   :  { %v1025_v45 = vmul.f32 %v1928_v36, %v2920_v43  ;;  %v1454_v43 = vld [vmem:[%s3256_s6 + $0x1e0] sm:$0xff] }
 0x3b9   :  { %1036 = vst.msk [vmem:[#allocation5 + $0x30] sm:$0xff] %vm764_vm0, %v1027_v13  ;;  %1577 = vmatmul.mubr.msk.f32.gmra.mrb[30].mxu1 %vm764_vm0, %v1017_v23 }
 0x3ba   :  { %v1930_v48 = vpop.eup %1929  ;;  %1290 = vmatprep.mubr.f32.mxu1 %v1972_v7  ;;  %1035 = vst.msk [vmem:[#allocation5 + $0x28] sm:$0xff] %vm764_vm0, %v1025_v45 }
 0x3bb   :  { %v1029_v4 = vmul.f32 %v1930_v48, %v2928_v52  ;;  %v1856_v52 = vpack.c.bf16 %v1456_v51, %v1454_v43 }
 0x3bd   :  { %1578 = vmatmul.mubr.msk.f32.vlgmr.msra.gmra.mrb[28].mxu1 %vm764_vm0, %v1023_v63  ;;  %1037 = vst.msk [vmem:[#allocation5 + $0x38] sm:$0xff] %vm764_vm0, %v1029_v4  ;;  %1857 = vmatpush1.bf16.msra.mxu0 %v1856_v52 }
 0x3be   :  { %1793 = vmatpush1.bf16.msra.mxu1 %v1792_v56  ;;  %1296 = vmatprep.mubr.f32.mxu1 %v1972_v7 }
 0x3c1   :  { %1579 = vmatmul.mubr.msk.f32.gmra.mrb[30].mxu1 %vm764_vm0, %v1025_v45 }
 0x3c2   :  { %1377 = vmatprep.mubr.f32.mxu1 %v1972_v7 }
 0x3c5   :  { %1580 = vmatmul.mubr.msk.f32.vlgmr.msra.gmra.mrb[28].mxu1 %vm764_vm0, %v1027_v13 }
 0x3c6   :  { %1383 = vmatprep.mubr.f32.mxu1 %v1972_v7 }
 0x3c9   :  { %1581 = vmatmul.mubr.msk.f32.gmra.mrb[30].mxu1 %vm764_vm0, %v1029_v4 }
 0x498   :  { %v1379_v1 = vpop.f32.mrb[28].mxu1 }
 0x499   :  { %v1381_v9 = vpop.f32.mrb[29].mxu1 }
 0x49a   :  { %1534 = vmatprep.mubr.f32.mxu0 %v1381_v9 }
 0x49b   :  { %1535 = vmatmul.mubr.f32.vlgmr.msra.gmra.mrb[8].mxu0 %v1379_v1 }
 0x49c   :  { %v1385_v10 = vpop.f32.mrb[30].mxu1 }
 0x49d   :  { %v1387_v2 = vpop.f32.mrb[31].mxu1 }
 0x49e   :  { %1540 = vmatprep.mubr.f32.mxu0 %v1387_v2 }
 0x49f   :  { %1541 = vmatmul.mubr.f32.gmra.mrb[10].mxu0 %v1385_v10 }
 0x4a0   :  { %1954 = shalt.err (!%p1951_p9)
}
 0x4a1   :  { %s1955_s14 = scalar_lea.hbm %s3260_s10, 1024 }
 0x4a2   :  { %p1956_p10 = scmp.ne.s32.totalorder %s3260_s10, %s1955_s14  ;;  %p1959_p11 = scmp.lt.u32.totalorder %s1955_s14, %s3260_s10 }
 0x4a4   :  { %p1961_p12 = pnand %p1959_p11, %p1956_p10 }
 0x4a6   :  { %1964 = shalt.err (!%p1961_p12)
}
 0x4a7   :  { %s1974_s18 = smov 128   ;;  %s1975_s19 = smov 8   ;;  %v1458_v54 = vld [vmem:[%s3257_s7] sm:$0x3] }
 0x4a8   :  { %1564 = dma.vmem_to_hbm [thread:$0]  %s1559_s12, 1024, %s3260_s10, [#allocation3], %s1974_s18, %s1974_s18, %s1975_s19   ;;  %v1463_v60 = vrot.slane %v1458_v54, %v2455_v14  ;;  %v1467_v59 = vrot.slane %v1458_v54, %v2469_v25 }
 0x56e   :  { %v1536_v62 = vpop.f32.mrb[8].mxu0 }
 0x56f   :  { %v1537_v56 = vadd.f32 %v1536_v62, %v1463_v60  ;;  %v1538_v7 = vpop.f32.mrb[9].mxu0 }
 0x570   :  { %v1539_v39 = vadd.f32 %v1538_v7, %v1467_v59 }
 0x571   :  { %1547 = vst [vmem:[%s3259_s9] sm:$0xff] %v1537_v56 }
 0x572   :  { %1548 = vst [vmem:[%s3259_s9 + $0x8] sm:$0xff] %v1539_v39  ;;  %v1542_v44 = vpop.f32.mrb[10].mxu0 }
 0x573   :  { %v1543_v17 = vadd.f32 %v1542_v44, %v1463_v60  ;;  %v1544_v49 = vpop.f32.mrb[11].mxu0 }
 0x574   :  { %v1545_v41 = vadd.f32 %v1544_v49, %v1467_v59 }
 0x575   :  { %1549 = vst [vmem:[%s3259_s9 + $0x10] sm:$0xff] %v1543_v17 }
 0x576   :  { %1550 = vst [vmem:[%s3259_s9 + $0x18] sm:$0xff] %v1545_v41 }
 0x577   :  { %1967 = dma.done.wait [#allocation3], 1024  }
 0x578   :  { %1968 = vsyncadd [#allocation3], 4294966272 }
 0x579   :  { %1570 = vsyncpa [#allocation3], 1 }
 0x57a   :  { %1571 = vsyncpa [#allocation4], 1 }

</bundles_post_ra>
